<compile_context>
chip_gen: v6e
topology: v6e:2x2x1
jax: 0.10.0
libtpu: 0.0.40
codegen_flags: <defaults>
</compile_context>

<pallas_src>
import functools
import numpy as np
import jax
import jax.numpy as jnp
from jax import lax
from jax.experimental import pallas as pl
from jax.experimental.pallas import tpu as pltpu

# act_gr = GeneralRelu(leak=0.1, sub=0.4, maxv=None)
LEAK, SUB = 0.1, 0.4


def _general_relu(x, leak=LEAK, sub=SUB):
    return jnp.where(x >= 0, x, leak * x) - sub


def _round_up(x, m):
    return (x + m - 1) // m * m


# ------------------------------ fused kernel --------------------------------

def _resblock_kernel(*refs, H, W, Cin, nf, KH, KW, Wp, LW, S0, LBUF_H,
                     n_out, Ho, Wo, stride, use_pool, has_idconv):
    """One grid step == one image.  All maps are (C, flat) lane-major.

    x_ref holds the zero-padded image flattened row-major with row pitch Wp
    (x[i, j] at flat index (i+pad)*Wp + (j+pad)); conv output position (i, j)
    of the stride-1 map lives at flat index m = i*Wp + j.
    """
    refs = list(refs)
    x_ref = refs.pop(0)
    w1_ref = refs.pop(0); b1_ref = refs.pop(0)
    w2_ref = refs.pop(0); b2_ref = refs.pop(0)
    wid_ref = bid_ref = sel_ref = None
    if has_idconv:
        wid_ref = refs.pop(0); bid_ref = refs.pop(0)
    mask_ref = refs.pop(0)
    if use_pool:
        sel_ref = refs.pop(0)
    o_ref = refs.pop(0)
    (h_s,) = refs

    f32, bf16 = jnp.float32, jnp.bfloat16
    pad = KH // 2
    poff = pad * Wp + pad              # flat offset of x[0, 0] inside the padded map

    # ---- conv1 (stride 1, pad ks//2): per-tap accumulation, bf16 MXU / f32 acc
    acc1 = jnp.zeros((nf, LW), f32)
    for t in range(KH * KW):
        kh, kw = divmod(t, KW)
        off = kh * Wp + kw
        acc1 = acc1 + jnp.dot(w1_ref[t],
                              x_ref[0, :, off:off + LW].astype(bf16),
                              preferred_element_type=f32)
    # bias + GeneralRelu; the mask zeroes pad-ring / rounding-junk lanes so the
    # stored map is a correctly zero-padded conv2 input.
    h1 = _general_relu(acc1 + b1_ref[...]) * mask_ref[...]

    # ---- keep only the small halo margins of h_s zeroed (re-done every step:
    # cheap, and safe under "parallel" multi-core grid sharding where a
    # zero-on-first-program-id trick would never run on the second core).
    h_s[:, :S0] = jnp.zeros((nf, S0), bf16)
    if LBUF_H > S0 + LW:
        h_s[:, S0 + LW:] = jnp.zeros((nf, LBUF_H - S0 - LW), bf16)
    h_s[:, S0:S0 + LW] = h1.astype(bf16)        # 128-lane-aligned unmasked store

    # ---- conv2 (no activation): per-tap accumulation over the padded h map ---
    hb = S0 - poff                               # flat index of h_padded[0, 0]
    acc2 = jnp.zeros((nf, LW), f32)
    for t in range(KH * KW):
        kh, kw = divmod(t, KW)
        off = hb + kh * Wp + kw
        acc2 = acc2 + jnp.dot(w2_ref[t], h_s[:, off:off + LW],
                              preferred_element_type=f32)
    y2 = acc2 + b2_ref[...]

    # ---- identity branch: AvgPool2d(2) (stride != 1), 1x1 idconv (ni != nf) --
    if use_pool:
        idm = (x_ref[0, :, poff:poff + LW]
               + x_ref[0, :, poff + 1:poff + 1 + LW]
               + x_ref[0, :, poff + Wp:poff + Wp + LW]
               + x_ref[0, :, poff + Wp + 1:poff + Wp + 1 + LW]) * 0.25
    else:
        idm = x_ref[0, :, poff:poff + LW]
    if has_idconv:
        idm = jnp.dot(wid_ref[...], idm.astype(bf16),
                      preferred_element_type=f32) + bid_ref[...]

    # ---- residual add + GeneralRelu, then per-row (strided) output selection --
    res = _general_relu(y2 + idm)
    if o_ref.shape[-1] > n_out:                  # zero the lane-padding tail
        o_ref[0, :, n_out:] = jnp.zeros((nf, o_ref.shape[-1] - n_out), o_ref.dtype)
    for u in range(Ho):
        row = res[:, stride * u * Wp: stride * u * Wp + W]          # (nf, W)
        if stride != 1:
            # tiny exact one-hot column selection (W, Wo); replaces the old
            # (LW, n_out) gsel constant and its K=LW matmul.
            row = jnp.dot(row, sel_ref[...], preferred_element_type=f32)
        o_ref[0, :, u * Wo:(u + 1) * Wo] = row.astype(o_ref.dtype)


# ------------------------------- wrapper -------------------------------------

def res_block_forward(x_nchw, params, *, stride=1):
    """ResBlock.forward: act(convs(x) + idconv(pool(x))).  NCHW in / NCHW out."""
    N, Cin, H, W = x_nchw.shape
    KH, KW, wcin, nf = params['w1'].shape
    assert wcin == Cin
    assert KH == KW and KH % 2 == 1, "odd square kernel required"
    assert stride in (1, 2)   # ResBlock shapes only line up for stride 1 / 2
    if stride != 1:
        # TODO(synk): AvgPool2d(2, ceil_mode=True) partial windows (odd H/W) not implemented.
        assert H % 2 == 0 and W % 2 == 0

    pad = KH // 2
    Hp, Wp = H + 2 * pad, W + 2 * pad
    Ho, Wo = (H - 1) // stride + 1, (W - 1) // stride + 1
    n_out = Ho * Wo
    n_out_pad = _round_up(n_out, 128)            # lane-dense HBM writeback
    LW = _round_up(H * Wp, 128)                  # stride-1 flat map width (lanes)
    LBUF_X = _round_up(2 * pad * (Wp + 1) + LW, 128)   # padded input + tap halo
    S0 = _round_up(pad * Wp + pad, 128)          # aligned store base for conv1 act
    LBUF_H = _round_up(S0 + pad * Wp + pad + LW, 128)
    has_idconv = 'wid' in params
    use_pool = stride != 1
    f32, bf16 = jnp.float32, jnp.bfloat16

    # ---- wrapper-side zero padding: one contiguous DMA per image instead of H
    # lane-misaligned row copies inside the kernel.
    xp = jnp.pad(x_nchw.astype(f32), ((0, 0), (0, 0), (pad, pad), (pad, pad)))
    xp = xp.reshape(N, Cin, Hp * Wp)
    xp = jnp.pad(xp, ((0, 0), (0, 0), (0, LBUF_X - Hp * Wp)))

    # ---- per-tap weight layout (tap-major), pre-cast to bf16 for the MXU -----
    w1t = jnp.transpose(jnp.asarray(params['w1'], f32), (0, 1, 3, 2)) \
             .reshape(KH * KW, nf, Cin).astype(bf16)
    w2t = jnp.transpose(jnp.asarray(params['w2'], f32), (0, 1, 3, 2)) \
             .reshape(KH * KW, nf, nf).astype(bf16)
    b1c = jnp.asarray(params['b1'], f32).reshape(nf, 1)
    b2c = jnp.asarray(params['b2'], f32).reshape(nf, 1)

    # valid-pixel mask for the stride-1 conv1 map (zeroes pad ring / junk lanes)
    m = np.arange(LW)
    mask_np = (((m // Wp) < H) & ((m % Wp) < W)).astype(np.float32)[None, :]

    inputs = [xp, w1t, b1c, w2t, b2c]
    in_specs = [
        pl.BlockSpec((1, Cin, LBUF_X), lambda n: (n, 0, 0)),
        pl.BlockSpec((KH * KW, nf, Cin), lambda n: (0, 0, 0)),
        pl.BlockSpec((nf, 1), lambda n: (0, 0)),
        pl.BlockSpec((KH * KW, nf, nf), lambda n: (0, 0, 0)),
        pl.BlockSpec((nf, 1), lambda n: (0, 0)),
    ]
    if has_idconv:
        inputs += [jnp.asarray(params['wid'], f32).reshape(Cin, nf).T.astype(bf16),
                   jnp.asarray(params['bid'], f32).reshape(nf, 1)]
        in_specs += [pl.BlockSpec((nf, Cin), lambda n: (0, 0)),
                     pl.BlockSpec((nf, 1), lambda n: (0, 0))]
    inputs.append(jnp.asarray(mask_np))
    in_specs.append(pl.BlockSpec((1, LW), lambda n: (0, 0)))
    if use_pool:
        sel_np = np.zeros((W, Wo), np.float32)   # exact one-hot column selector
        sel_np[stride * np.arange(Wo), np.arange(Wo)] = 1.0
        inputs.append(jnp.asarray(sel_np))
        in_specs.append(pl.BlockSpec((W, Wo), lambda n: (0, 0)))

    kernel = functools.partial(
        _resblock_kernel, H=H, W=W, Cin=Cin, nf=nf, KH=KH, KW=KW, Wp=Wp,
        LW=LW, S0=S0, LBUF_H=LBUF_H, n_out=n_out, Ho=Ho, Wo=Wo,
        stride=stride, use_pool=use_pool, has_idconv=has_idconv)

    # TODO(synk): batch several images per grid step along the lane axis to raise
    # MXU occupancy and amortize the ~0.35us per-grid-step overhead at small sizes.
    out = pl.pallas_call(
        kernel,
        out_shape=jax.ShapeDtypeStruct((N, nf, n_out_pad), f32),
        grid=(N,),
        in_specs=in_specs,
        out_specs=pl.BlockSpec((1, nf, n_out_pad), lambda n: (n, 0, 0)),
        scratch_shapes=[pltpu.VMEM((nf, LBUF_H), bf16)],   # padded conv1 activation
        compiler_params=pltpu.CompilerParams(
            dimension_semantics=("parallel",),             # megacore / 2-TC sharding
            vmem_limit_bytes=64 * 1024 * 1024),            # explicit v7x budget
    )(*inputs)
    return out[:, :, :n_out].reshape(N, nf, Ho, Wo)        # already NCHW


# ------------------------------ params / reference ---------------------------

def init_resblock_params(key, ni, nf, ks=3):
    """Deterministic synthetic params (shapes from ResBlock.__init__), HWIO layout."""
    k = jax.random.split(key, 6)
    p = dict(
        w1=jax.random.normal(k[0], (ks, ks, ni, nf), jnp.float32) * 0.1,
        b1=jax.random.normal(k[1], (nf,), jnp.float32) * 0.1,
        w2=jax.random.normal(k[2], (ks, ks, nf, nf), jnp.float32) * 0.1,
        b2=jax.random.normal(k[3], (nf,), jnp.float32) * 0.1,
    )
    if ni != nf:  # idconv = conv(ni, nf, ks=1, stride=1, act=None)
        p['wid'] = jax.random.normal(k[4], (1, 1, ni, nf), jnp.float32) * 0.1
        p['bid'] = jax.random.normal(k[5], (nf,), jnp.float32) * 0.1
    return p


def _ref_forward(x_nchw, params, *, stride=1):
    x = jnp.transpose(x_nchw, (0, 2, 3, 1)).astype(jnp.float32)

    def conv(x, w, b, s, pad):
        y = lax.conv_general_dilated(x, w, (s, s), ((pad, pad), (pad, pad)),
                                     dimension_numbers=('NHWC', 'HWIO', 'NHWC'))
        return y + b

    h = _general_relu(conv(x, params['w1'], params['b1'], 1, 1))
    h = conv(h, params['w2'], params['b2'], stride, 1)
    idx = x
    if stride != 1:
        N, H, W, C = idx.shape
        idx = idx.reshape(N, H // 2, 2, W // 2, 2, C).mean(axis=(2, 4))
    if 'wid' in params:
        idx = conv(idx, params['wid'], params['bid'], 1, 0)
    return jnp.transpose(_general_relu(h + idx), (0, 3, 1, 2))


if __name__ == "__main__":
    key = jax.random.PRNGKey(0)
    kp, kx = jax.random.split(key)

    # stride=2, ni != nf: pool + idconv path (main test case).
    ni, nf = 4, 8
    params = init_resblock_params(kp, ni, nf)
    x = jax.random.normal(kx, (2, ni, 16, 16), jnp.float32)   # NCHW, like PyTorch
    y = jax.block_until_ready(res_block_forward(x, params, stride=2))
    y_ref = jax.block_until_ready(_ref_forward(x, params, stride=2))
    assert y.shape == (2, nf, 8, 8), y.shape
    # bf16 MXU operands (f32 accumulation) -> slightly looser tolerance than f32.
    np.testing.assert_allclose(np.asarray(y), np.asarray(y_ref), rtol=2e-2, atol=2e-2)

    # stride=1, ni == nf: identity pass-through path.
    params1 = init_resblock_params(kp, 8, 8)
    x1 = jax.random.normal(kx, (2, 8, 16, 16), jnp.float32)
    y1 = jax.block_until_ready(res_block_forward(x1, params1, stride=1))
    y1_ref = jax.block_until_ready(_ref_forward(x1, params1, stride=1))
    assert y1.shape == (2, 8, 16, 16), y1.shape
    np.testing.assert_allclose(np.asarray(y1), np.asarray(y1_ref), rtol=2e-2, atol=2e-2)

    print("KERNEL_OK")
</pallas_src>

<mosaic_0001>
module attributes {stable_mosaic.version = 11 : i64} {
  func.func @_resblock_kernel(%arg0: i32, %arg1: memref<1x4x512xf32, #tpu.memory_space<vmem>>, %arg2: memref<9x8x4xbf16, #tpu.memory_space<vmem>>, %arg3: memref<8x1xf32, #tpu.memory_space<vmem>>, %arg4: memref<9x8x8xbf16, #tpu.memory_space<vmem>>, %arg5: memref<8x1xf32, #tpu.memory_space<vmem>>, %arg6: memref<8x4xbf16, #tpu.memory_space<vmem>>, %arg7: memref<8x1xf32, #tpu.memory_space<vmem>>, %arg8: memref<1x384xf32, #tpu.memory_space<vmem>>, %arg9: memref<16x8xf32, #tpu.memory_space<vmem>>, %arg10: memref<1x8x128xf32, #tpu.memory_space<vmem>>, %arg11: memref<8x640xbf16, #tpu.memory_space<vmem>>) attributes {dimension_semantics = [#tpu.dimension_semantics<parallel>], iteration_bounds = array<i64: 2>, scalar_prefetch = 0 : i64, scratch_operands = 1 : i64, tpu.core_type = #tpu.core_type<tc>, window_params = [{transform_indices = @transform_0, window_bounds = array<i64: 1, 4, 512>}, {pipeline_mode = #tpu.pipeline_mode<synchronous>, transform_indices = @transform_1, window_bounds = array<i64: 9, 8, 4>}, {pipeline_mode = #tpu.pipeline_mode<synchronous>, transform_indices = @transform_2, window_bounds = array<i64: 8, 1>}, {pipeline_mode = #tpu.pipeline_mode<synchronous>, transform_indices = @transform_3, window_bounds = array<i64: 9, 8, 8>}, {pipeline_mode = #tpu.pipeline_mode<synchronous>, transform_indices = @transform_4, window_bounds = array<i64: 8, 1>}, {pipeline_mode = #tpu.pipeline_mode<synchronous>, transform_indices = @transform_5, window_bounds = array<i64: 8, 4>}, {pipeline_mode = #tpu.pipeline_mode<synchronous>, transform_indices = @transform_6, window_bounds = array<i64: 8, 1>}, {pipeline_mode = #tpu.pipeline_mode<synchronous>, transform_indices = @transform_7, window_bounds = array<i64: 1, 384>}, {pipeline_mode = #tpu.pipeline_mode<synchronous>, transform_indices = @transform_8, window_bounds = array<i64: 16, 8>}, {transform_indices = @transform_9, window_bounds = array<i64: 1, 8, 128>}]} {
    %cst = arith.constant 0.000000e+00 : f32
    %0 = vector.broadcast %cst : f32 to vector<8x384xf32>
    %c0 = arith.constant 0 : index
    %c0_0 = arith.constant 0 : index
    %c0_1 = arith.constant 0 : index
    %1 = vector.load %arg2[%c0, %c0_0, %c0_1] : memref<9x8x4xbf16, #tpu.memory_space<vmem>>, vector<1x8x4xbf16>
    %2 = vector.shape_cast %1 : vector<1x8x4xbf16> to vector<8x4xbf16>
    %c0_2 = arith.constant 0 : index
    %c0_3 = arith.constant 0 : index
    %c0_4 = arith.constant 0 : index
    %3 = vector.load %arg1[%c0_2, %c0_3, %c0_4] : memref<1x4x512xf32, #tpu.memory_space<vmem>>, vector<1x4x384xf32>
    %4 = vector.shape_cast %3 : vector<1x4x384xf32> to vector<4x384xf32>
    %5 = arith.truncf %4 : vector<4x384xf32> to vector<4x384xbf16>
    %cst_5 = arith.constant dense<0.000000e+00> : vector<8x384xf32>
    %6 = tpu.matmul %2, %5, %cst_5 {dimension_numbers = #tpu.dot_dimension_numbers<[1], [0], [0], [1], [0, 0, 1, 1], [], []>} : vector<8x4xbf16>, vector<4x384xbf16>, vector<8x384xf32> -> vector<8x384xf32>
    %7 = arith.addf %0, %6 : vector<8x384xf32>
    %c1 = arith.constant 1 : index
    %c0_6 = arith.constant 0 : index
    %c0_7 = arith.constant 0 : index
    %8 = vector.load %arg2[%c1, %c0_6, %c0_7] : memref<9x8x4xbf16, #tpu.memory_space<vmem>>, vector<1x8x4xbf16>
    %9 = vector.shape_cast %8 : vector<1x8x4xbf16> to vector<8x4xbf16>
    %c0_8 = arith.constant 0 : index
    %c0_9 = arith.constant 0 : index
    %c1_10 = arith.constant 1 : index
    %10 = vector.load %arg1[%c0_8, %c0_9, %c1_10] : memref<1x4x512xf32, #tpu.memory_space<vmem>>, vector<1x4x384xf32>
    %11 = vector.shape_cast %10 : vector<1x4x384xf32> to vector<4x384xf32>
    %12 = arith.truncf %11 : vector<4x384xf32> to vector<4x384xbf16>
    %cst_11 = arith.constant dense<0.000000e+00> : vector<8x384xf32>
    %13 = tpu.matmul %9, %12, %cst_11 {dimension_numbers = #tpu.dot_dimension_numbers<[1], [0], [0], [1], [0, 0, 1, 1], [], []>} : vector<8x4xbf16>, vector<4x384xbf16>, vector<8x384xf32> -> vector<8x384xf32>
    %14 = arith.addf %7, %13 : vector<8x384xf32>
    %c2 = arith.constant 2 : index
    %c0_12 = arith.constant 0 : index
    %c0_13 = arith.constant 0 : index
    %15 = vector.load %arg2[%c2, %c0_12, %c0_13] : memref<9x8x4xbf16, #tpu.memory_space<vmem>>, vector<1x8x4xbf16>
    %16 = vector.shape_cast %15 : vector<1x8x4xbf16> to vector<8x4xbf16>
    %c0_14 = arith.constant 0 : index
    %c0_15 = arith.constant 0 : index
    %c2_16 = arith.constant 2 : index
    %17 = vector.load %arg1[%c0_14, %c0_15, %c2_16] : memref<1x4x512xf32, #tpu.memory_space<vmem>>, vector<1x4x384xf32>
    %18 = vector.shape_cast %17 : vector<1x4x384xf32> to vector<4x384xf32>
    %19 = arith.truncf %18 : vector<4x384xf32> to vector<4x384xbf16>
    %cst_17 = arith.constant dense<0.000000e+00> : vector<8x384xf32>
    %20 = tpu.matmul %16, %19, %cst_17 {dimension_numbers = #tpu.dot_dimension_numbers<[1], [0], [0], [1], [0, 0, 1, 1], [], []>} : vector<8x4xbf16>, vector<4x384xbf16>, vector<8x384xf32> -> vector<8x384xf32>
    %21 = arith.addf %14, %20 : vector<8x384xf32>
    %c3 = arith.constant 3 : index
    %c0_18 = arith.constant 0 : index
    %c0_19 = arith.constant 0 : index
    %22 = vector.load %arg2[%c3, %c0_18, %c0_19] : memref<9x8x4xbf16, #tpu.memory_space<vmem>>, vector<1x8x4xbf16>
    %23 = vector.shape_cast %22 : vector<1x8x4xbf16> to vector<8x4xbf16>
    %c0_20 = arith.constant 0 : index
    %c0_21 = arith.constant 0 : index
    %c18 = arith.constant 18 : index
    %24 = vector.load %arg1[%c0_20, %c0_21, %c18] : memref<1x4x512xf32, #tpu.memory_space<vmem>>, vector<1x4x384xf32>
    %25 = vector.shape_cast %24 : vector<1x4x384xf32> to vector<4x384xf32>
    %26 = arith.truncf %25 : vector<4x384xf32> to vector<4x384xbf16>
    %cst_22 = arith.constant dense<0.000000e+00> : vector<8x384xf32>
    %27 = tpu.matmul %23, %26, %cst_22 {dimension_numbers = #tpu.dot_dimension_numbers<[1], [0], [0], [1], [0, 0, 1, 1], [], []>} : vector<8x4xbf16>, vector<4x384xbf16>, vector<8x384xf32> -> vector<8x384xf32>
    %28 = arith.addf %21, %27 : vector<8x384xf32>
    %c4 = arith.constant 4 : index
    %c0_23 = arith.constant 0 : index
    %c0_24 = arith.constant 0 : index
    %29 = vector.load %arg2[%c4, %c0_23, %c0_24] : memref<9x8x4xbf16, #tpu.memory_space<vmem>>, vector<1x8x4xbf16>
    %30 = vector.shape_cast %29 : vector<1x8x4xbf16> to vector<8x4xbf16>
    %c0_25 = arith.constant 0 : index
    %c0_26 = arith.constant 0 : index
    %c19 = arith.constant 19 : index
    %31 = vector.load %arg1[%c0_25, %c0_26, %c19] : memref<1x4x512xf32, #tpu.memory_space<vmem>>, vector<1x4x384xf32>
    %32 = vector.shape_cast %31 : vector<1x4x384xf32> to vector<4x384xf32>
    %33 = arith.truncf %32 : vector<4x384xf32> to vector<4x384xbf16>
    %cst_27 = arith.constant dense<0.000000e+00> : vector<8x384xf32>
    %34 = tpu.matmul %30, %33, %cst_27 {dimension_numbers = #tpu.dot_dimension_numbers<[1], [0], [0], [1], [0, 0, 1, 1], [], []>} : vector<8x4xbf16>, vector<4x384xbf16>, vector<8x384xf32> -> vector<8x384xf32>
    %35 = arith.addf %28, %34 : vector<8x384xf32>
    %c5 = arith.constant 5 : index
    %c0_28 = arith.constant 0 : index
    %c0_29 = arith.constant 0 : index
    %36 = vector.load %arg2[%c5, %c0_28, %c0_29] : memref<9x8x4xbf16, #tpu.memory_space<vmem>>, vector<1x8x4xbf16>
    %37 = vector.shape_cast %36 : vector<1x8x4xbf16> to vector<8x4xbf16>
    %c0_30 = arith.constant 0 : index
    %c0_31 = arith.constant 0 : index
    %c20 = arith.constant 20 : index
    %38 = vector.load %arg1[%c0_30, %c0_31, %c20] : memref<1x4x512xf32, #tpu.memory_space<vmem>>, vector<1x4x384xf32>
    %39 = vector.shape_cast %38 : vector<1x4x384xf32> to vector<4x384xf32>
    %40 = arith.truncf %39 : vector<4x384xf32> to vector<4x384xbf16>
    %cst_32 = arith.constant dense<0.000000e+00> : vector<8x384xf32>
    %41 = tpu.matmul %37, %40, %cst_32 {dimension_numbers = #tpu.dot_dimension_numbers<[1], [0], [0], [1], [0, 0, 1, 1], [], []>} : vector<8x4xbf16>, vector<4x384xbf16>, vector<8x384xf32> -> vector<8x384xf32>
    %42 = arith.addf %35, %41 : vector<8x384xf32>
    %c6 = arith.constant 6 : index
    %c0_33 = arith.constant 0 : index
    %c0_34 = arith.constant 0 : index
    %43 = vector.load %arg2[%c6, %c0_33, %c0_34] : memref<9x8x4xbf16, #tpu.memory_space<vmem>>, vector<1x8x4xbf16>
    %44 = vector.shape_cast %43 : vector<1x8x4xbf16> to vector<8x4xbf16>
    %c0_35 = arith.constant 0 : index
    %c0_36 = arith.constant 0 : index
    %c36 = arith.constant 36 : index
    %45 = vector.load %arg1[%c0_35, %c0_36, %c36] : memref<1x4x512xf32, #tpu.memory_space<vmem>>, vector<1x4x384xf32>
    %46 = vector.shape_cast %45 : vector<1x4x384xf32> to vector<4x384xf32>
    %47 = arith.truncf %46 : vector<4x384xf32> to vector<4x384xbf16>
    %cst_37 = arith.constant dense<0.000000e+00> : vector<8x384xf32>
    %48 = tpu.matmul %44, %47, %cst_37 {dimension_numbers = #tpu.dot_dimension_numbers<[1], [0], [0], [1], [0, 0, 1, 1], [], []>} : vector<8x4xbf16>, vector<4x384xbf16>, vector<8x384xf32> -> vector<8x384xf32>
    %49 = arith.addf %42, %48 : vector<8x384xf32>
    %c7 = arith.constant 7 : index
    %c0_38 = arith.constant 0 : index
    %c0_39 = arith.constant 0 : index
    %50 = vector.load %arg2[%c7, %c0_38, %c0_39] : memref<9x8x4xbf16, #tpu.memory_space<vmem>>, vector<1x8x4xbf16>
    %51 = vector.shape_cast %50 : vector<1x8x4xbf16> to vector<8x4xbf16>
    %c0_40 = arith.constant 0 : index
    %c0_41 = arith.constant 0 : index
    %c37 = arith.constant 37 : index
    %52 = vector.load %arg1[%c0_40, %c0_41, %c37] : memref<1x4x512xf32, #tpu.memory_space<vmem>>, vector<1x4x384xf32>
    %53 = vector.shape_cast %52 : vector<1x4x384xf32> to vector<4x384xf32>
    %54 = arith.truncf %53 : vector<4x384xf32> to vector<4x384xbf16>
    %cst_42 = arith.constant dense<0.000000e+00> : vector<8x384xf32>
    %55 = tpu.matmul %51, %54, %cst_42 {dimension_numbers = #tpu.dot_dimension_numbers<[1], [0], [0], [1], [0, 0, 1, 1], [], []>} : vector<8x4xbf16>, vector<4x384xbf16>, vector<8x384xf32> -> vector<8x384xf32>
    %56 = arith.addf %49, %55 : vector<8x384xf32>
    %c8 = arith.constant 8 : index
    %c0_43 = arith.constant 0 : index
    %c0_44 = arith.constant 0 : index
    %57 = vector.load %arg2[%c8, %c0_43, %c0_44] : memref<9x8x4xbf16, #tpu.memory_space<vmem>>, vector<1x8x4xbf16>
    %58 = vector.shape_cast %57 : vector<1x8x4xbf16> to vector<8x4xbf16>
    %c0_45 = arith.constant 0 : index
    %c0_46 = arith.constant 0 : index
    %c38 = arith.constant 38 : index
    %59 = vector.load %arg1[%c0_45, %c0_46, %c38] : memref<1x4x512xf32, #tpu.memory_space<vmem>>, vector<1x4x384xf32>
    %60 = vector.shape_cast %59 : vector<1x4x384xf32> to vector<4x384xf32>
    %61 = arith.truncf %60 : vector<4x384xf32> to vector<4x384xbf16>
    %cst_47 = arith.constant dense<0.000000e+00> : vector<8x384xf32>
    %62 = tpu.matmul %58, %61, %cst_47 {dimension_numbers = #tpu.dot_dimension_numbers<[1], [0], [0], [1], [0, 0, 1, 1], [], []>} : vector<8x4xbf16>, vector<4x384xbf16>, vector<8x384xf32> -> vector<8x384xf32>
    %63 = arith.addf %56, %62 : vector<8x384xf32>
    %c0_48 = arith.constant 0 : index
    %c0_49 = arith.constant 0 : index
    %64 = vector.load %arg3[%c0_48, %c0_49] : memref<8x1xf32, #tpu.memory_space<vmem>>, vector<8x1xf32>
    %65 = vector.broadcast %64 : vector<8x1xf32> to vector<8x384xf32>
    %66 = arith.addf %63, %65 : vector<8x384xf32>
    %cst_50 = arith.constant 0.000000e+00 : f32
    %67 = vector.broadcast %cst_50 : f32 to vector<8x384xf32>
    %68 = arith.cmpf oge, %66, %67 : vector<8x384xf32>
    %cst_51 = arith.constant 1.000000e-01 : f32
    %69 = vector.broadcast %cst_51 : f32 to vector<8x384xf32>
    %70 = arith.mulf %69, %66 : vector<8x384xf32>
    %71 = arith.select %68, %66, %70 : vector<8x384xi1>, vector<8x384xf32>
    %cst_52 = arith.constant 4.000000e-01 : f32
    %72 = vector.broadcast %cst_52 : f32 to vector<8x384xf32>
    %73 = arith.subf %71, %72 : vector<8x384xf32>
    %c0_53 = arith.constant 0 : index
    %c0_54 = arith.constant 0 : index
    %74 = vector.load %arg8[%c0_53, %c0_54] : memref<1x384xf32, #tpu.memory_space<vmem>>, vector<1x384xf32>
    %75 = vector.broadcast %74 : vector<1x384xf32> to vector<8x384xf32>
    %76 = arith.mulf %73, %75 : vector<8x384xf32>
    %cst_55 = arith.constant 0.000000e+00 : bf16
    %77 = vector.broadcast %cst_55 : bf16 to vector<8x128xbf16>
    %c0_56 = arith.constant 0 : index
    %c0_57 = arith.constant 0 : index
    %78 = vector.load %arg11[%c0_56, %c0_57] : memref<8x640xbf16, #tpu.memory_space<vmem>>, vector<8x128xbf16>
    tpu.vector_store %arg11[%c0_56, %c0_57], %77 {strides = array<i32>} : memref<8x640xbf16, #tpu.memory_space<vmem>>, vector<8x128xbf16>,
    %cst_58 = arith.constant 0.000000e+00 : bf16
    %79 = vector.broadcast %cst_58 : bf16 to vector<8x128xbf16>
    %c0_59 = arith.constant 0 : index
    %c512 = arith.constant 512 : index
    %80 = vector.load %arg11[%c0_59, %c512] : memref<8x640xbf16, #tpu.memory_space<vmem>>, vector<8x128xbf16>
    tpu.vector_store %arg11[%c0_59, %c512], %79 {strides = array<i32>} : memref<8x640xbf16, #tpu.memory_space<vmem>>, vector<8x128xbf16>,
    %81 = arith.truncf %76 : vector<8x384xf32> to vector<8x384xbf16>
    %c0_60 = arith.constant 0 : index
    %c128 = arith.constant 128 : index
    %82 = vector.load %arg11[%c0_60, %c128] : memref<8x640xbf16, #tpu.memory_space<vmem>>, vector<8x384xbf16>
    tpu.vector_store %arg11[%c0_60, %c128], %81 {strides = array<i32>} : memref<8x640xbf16, #tpu.memory_space<vmem>>, vector<8x384xbf16>,
    %cst_61 = arith.constant 0.000000e+00 : f32
    %83 = vector.broadcast %cst_61 : f32 to vector<8x384xf32>
    %c0_62 = arith.constant 0 : index
    %c0_63 = arith.constant 0 : index
    %c0_64 = arith.constant 0 : index
    %84 = vector.load %arg4[%c0_62, %c0_63, %c0_64] : memref<9x8x8xbf16, #tpu.memory_space<vmem>>, vector<1x8x8xbf16>
    %85 = vector.shape_cast %84 : vector<1x8x8xbf16> to vector<8x8xbf16>
    %c0_65 = arith.constant 0 : index
    %c109 = arith.constant 109 : index
    %86 = vector.load %arg11[%c0_65, %c109] : memref<8x640xbf16, #tpu.memory_space<vmem>>, vector<8x384xbf16>
    %cst_66 = arith.constant dense<0.000000e+00> : vector<8x384xf32>
    %87 = tpu.matmul %85, %86, %cst_66 {dimension_numbers = #tpu.dot_dimension_numbers<[1], [0], [0], [1], [0, 0, 1, 1], [], []>} : vector<8x8xbf16>, vector<8x384xbf16>, vector<8x384xf32> -> vector<8x384xf32>
    %88 = arith.addf %83, %87 : vector<8x384xf32>
    %c1_67 = arith.constant 1 : index
    %c0_68 = arith.constant 0 : index
    %c0_69 = arith.constant 0 : index
    %89 = vector.load %arg4[%c1_67, %c0_68, %c0_69] : memref<9x8x8xbf16, #tpu.memory_space<vmem>>, vector<1x8x8xbf16>
    %90 = vector.shape_cast %89 : vector<1x8x8xbf16> to vector<8x8xbf16>
    %c0_70 = arith.constant 0 : index
    %c110 = arith.constant 110 : index
    %91 = vector.load %arg11[%c0_70, %c110] : memref<8x640xbf16, #tpu.memory_space<vmem>>, vector<8x384xbf16>
    %cst_71 = arith.constant dense<0.000000e+00> : vector<8x384xf32>
    %92 = tpu.matmul %90, %91, %cst_71 {dimension_numbers = #tpu.dot_dimension_numbers<[1], [0], [0], [1], [0, 0, 1, 1], [], []>} : vector<8x8xbf16>, vector<8x384xbf16>, vector<8x384xf32> -> vector<8x384xf32>
    %93 = arith.addf %88, %92 : vector<8x384xf32>
    %c2_72 = arith.constant 2 : index
    %c0_73 = arith.constant 0 : index
    %c0_74 = arith.constant 0 : index
    %94 = vector.load %arg4[%c2_72, %c0_73, %c0_74] : memref<9x8x8xbf16, #tpu.memory_space<vmem>>, vector<1x8x8xbf16>
    %95 = vector.shape_cast %94 : vector<1x8x8xbf16> to vector<8x8xbf16>
    %c0_75 = arith.constant 0 : index
    %c111 = arith.constant 111 : index
    %96 = vector.load %arg11[%c0_75, %c111] : memref<8x640xbf16, #tpu.memory_space<vmem>>, vector<8x384xbf16>
    %cst_76 = arith.constant dense<0.000000e+00> : vector<8x384xf32>
    %97 = tpu.matmul %95, %96, %cst_76 {dimension_numbers = #tpu.dot_dimension_numbers<[1], [0], [0], [1], [0, 0, 1, 1], [], []>} : vector<8x8xbf16>, vector<8x384xbf16>, vector<8x384xf32> -> vector<8x384xf32>
    %98 = arith.addf %93, %97 : vector<8x384xf32>
    %c3_77 = arith.constant 3 : index
    %c0_78 = arith.constant 0 : index
    %c0_79 = arith.constant 0 : index
    %99 = vector.load %arg4[%c3_77, %c0_78, %c0_79] : memref<9x8x8xbf16, #tpu.memory_space<vmem>>, vector<1x8x8xbf16>
    %100 = vector.shape_cast %99 : vector<1x8x8xbf16> to vector<8x8xbf16>
    %c0_80 = arith.constant 0 : index
    %c127 = arith.constant 127 : index
    %101 = vector.load %arg11[%c0_80, %c127] : memref<8x640xbf16, #tpu.memory_space<vmem>>, vector<8x384xbf16>
    %cst_81 = arith.constant dense<0.000000e+00> : vector<8x384xf32>
    %102 = tpu.matmul %100, %101, %cst_81 {dimension_numbers = #tpu.dot_dimension_numbers<[1], [0], [0], [1], [0, 0, 1, 1], [], []>} : vector<8x8xbf16>, vector<8x384xbf16>, vector<8x384xf32> -> vector<8x384xf32>
    %103 = arith.addf %98, %102 : vector<8x384xf32>
    %c4_82 = arith.constant 4 : index
    %c0_83 = arith.constant 0 : index
    %c0_84 = arith.constant 0 : index
    %104 = vector.load %arg4[%c4_82, %c0_83, %c0_84] : memref<9x8x8xbf16, #tpu.memory_space<vmem>>, vector<1x8x8xbf16>
    %105 = vector.shape_cast %104 : vector<1x8x8xbf16> to vector<8x8xbf16>
    %c0_85 = arith.constant 0 : index
    %c128_86 = arith.constant 128 : index
    %106 = vector.load %arg11[%c0_85, %c128_86] : memref<8x640xbf16, #tpu.memory_space<vmem>>, vector<8x384xbf16>
    %cst_87 = arith.constant dense<0.000000e+00> : vector<8x384xf32>
    %107 = tpu.matmul %105, %106, %cst_87 {dimension_numbers = #tpu.dot_dimension_numbers<[1], [0], [0], [1], [0, 0, 1, 1], [], []>} : vector<8x8xbf16>, vector<8x384xbf16>, vector<8x384xf32> -> vector<8x384xf32>
    %108 = arith.addf %103, %107 : vector<8x384xf32>
    %c5_88 = arith.constant 5 : index
    %c0_89 = arith.constant 0 : index
    %c0_90 = arith.constant 0 : index
    %109 = vector.load %arg4[%c5_88, %c0_89, %c0_90] : memref<9x8x8xbf16, #tpu.memory_space<vmem>>, vector<1x8x8xbf16>
    %110 = vector.shape_cast %109 : vector<1x8x8xbf16> to vector<8x8xbf16>
    %c0_91 = arith.constant 0 : index
    %c129 = arith.constant 129 : index
    %111 = vector.load %arg11[%c0_91, %c129] : memref<8x640xbf16, #tpu.memory_space<vmem>>, vector<8x384xbf16>
    %cst_92 = arith.constant dense<0.000000e+00> : vector<8x384xf32>
    %112 = tpu.matmul %110, %111, %cst_92 {dimension_numbers = #tpu.dot_dimension_numbers<[1], [0], [0], [1], [0, 0, 1, 1], [], []>} : vector<8x8xbf16>, vector<8x384xbf16>, vector<8x384xf32> -> vector<8x384xf32>
    %113 = arith.addf %108, %112 : vector<8x384xf32>
    %c6_93 = arith.constant 6 : index
    %c0_94 = arith.constant 0 : index
    %c0_95 = arith.constant 0 : index
    %114 = vector.load %arg4[%c6_93, %c0_94, %c0_95] : memref<9x8x8xbf16, #tpu.memory_space<vmem>>, vector<1x8x8xbf16>
    %115 = vector.shape_cast %114 : vector<1x8x8xbf16> to vector<8x8xbf16>
    %c0_96 = arith.constant 0 : index
    %c145 = arith.constant 145 : index
    %116 = vector.load %arg11[%c0_96, %c145] : memref<8x640xbf16, #tpu.memory_space<vmem>>, vector<8x384xbf16>
    %cst_97 = arith.constant dense<0.000000e+00> : vector<8x384xf32>
    %117 = tpu.matmul %115, %116, %cst_97 {dimension_numbers = #tpu.dot_dimension_numbers<[1], [0], [0], [1], [0, 0, 1, 1], [], []>} : vector<8x8xbf16>, vector<8x384xbf16>, vector<8x384xf32> -> vector<8x384xf32>
    %118 = arith.addf %113, %117 : vector<8x384xf32>
    %c7_98 = arith.constant 7 : index
    %c0_99 = arith.constant 0 : index
    %c0_100 = arith.constant 0 : index
    %119 = vector.load %arg4[%c7_98, %c0_99, %c0_100] : memref<9x8x8xbf16, #tpu.memory_space<vmem>>, vector<1x8x8xbf16>
    %120 = vector.shape_cast %119 : vector<1x8x8xbf16> to vector<8x8xbf16>
    %c0_101 = arith.constant 0 : index
    %c146 = arith.constant 146 : index
    %121 = vector.load %arg11[%c0_101, %c146] : memref<8x640xbf16, #tpu.memory_space<vmem>>, vector<8x384xbf16>
    %cst_102 = arith.constant dense<0.000000e+00> : vector<8x384xf32>
    %122 = tpu.matmul %120, %121, %cst_102 {dimension_numbers = #tpu.dot_dimension_numbers<[1], [0], [0], [1], [0, 0, 1, 1], [], []>} : vector<8x8xbf16>, vector<8x384xbf16>, vector<8x384xf32> -> vector<8x384xf32>
    %123 = arith.addf %118, %122 : vector<8x384xf32>
    %c8_103 = arith.constant 8 : index
    %c0_104 = arith.constant 0 : index
    %c0_105 = arith.constant 0 : index
    %124 = vector.load %arg4[%c8_103, %c0_104, %c0_105] : memref<9x8x8xbf16, #tpu.memory_space<vmem>>, vector<1x8x8xbf16>
    %125 = vector.shape_cast %124 : vector<1x8x8xbf16> to vector<8x8xbf16>
    %c0_106 = arith.constant 0 : index
    %c147 = arith.constant 147 : index
    %126 = vector.load %arg11[%c0_106, %c147] : memref<8x640xbf16, #tpu.memory_space<vmem>>, vector<8x384xbf16>
    %cst_107 = arith.constant dense<0.000000e+00> : vector<8x384xf32>
    %127 = tpu.matmul %125, %126, %cst_107 {dimension_numbers = #tpu.dot_dimension_numbers<[1], [0], [0], [1], [0, 0, 1, 1], [], []>} : vector<8x8xbf16>, vector<8x384xbf16>, vector<8x384xf32> -> vector<8x384xf32>
    %128 = arith.addf %123, %127 : vector<8x384xf32>
    %c0_108 = arith.constant 0 : index
    %c0_109 = arith.constant 0 : index
    %129 = vector.load %arg5[%c0_108, %c0_109] : memref<8x1xf32, #tpu.memory_space<vmem>>, vector<8x1xf32>
    %130 = vector.broadcast %129 : vector<8x1xf32> to vector<8x384xf32>
    %131 = arith.addf %128, %130 : vector<8x384xf32>
    %c0_110 = arith.constant 0 : index
    %c0_111 = arith.constant 0 : index
    %c19_112 = arith.constant 19 : index
    %132 = vector.load %arg1[%c0_110, %c0_111, %c19_112] : memref<1x4x512xf32, #tpu.memory_space<vmem>>, vector<1x4x384xf32>
    %133 = vector.shape_cast %132 : vector<1x4x384xf32> to vector<4x384xf32>
    %c0_113 = arith.constant 0 : index
    %c0_114 = arith.constant 0 : index
    %c20_115 = arith.constant 20 : index
    %134 = vector.load %arg1[%c0_113, %c0_114, %c20_115] : memref<1x4x512xf32, #tpu.memory_space<vmem>>, vector<1x4x384xf32>
    %135 = vector.shape_cast %134 : vector<1x4x384xf32> to vector<4x384xf32>
    %136 = arith.addf %133, %135 : vector<4x384xf32>
    %c0_116 = arith.constant 0 : index
    %c0_117 = arith.constant 0 : index
    %c37_118 = arith.constant 37 : index
    %137 = vector.load %arg1[%c0_116, %c0_117, %c37_118] : memref<1x4x512xf32, #tpu.memory_space<vmem>>, vector<1x4x384xf32>
    %138 = vector.shape_cast %137 : vector<1x4x384xf32> to vector<4x384xf32>
    %139 = arith.addf %136, %138 : vector<4x384xf32>
    %c0_119 = arith.constant 0 : index
    %c0_120 = arith.constant 0 : index
    %c38_121 = arith.constant 38 : index
    %140 = vector.load %arg1[%c0_119, %c0_120, %c38_121] : memref<1x4x512xf32, #tpu.memory_space<vmem>>, vector<1x4x384xf32>
    %141 = vector.shape_cast %140 : vector<1x4x384xf32> to vector<4x384xf32>
    %142 = arith.addf %139, %141 : vector<4x384xf32>
    %cst_122 = arith.constant 2.500000e-01 : f32
    %143 = vector.broadcast %cst_122 : f32 to vector<4x384xf32>
    %144 = arith.mulf %142, %143 : vector<4x384xf32>
    %c0_123 = arith.constant 0 : index
    %c0_124 = arith.constant 0 : index
    %145 = vector.load %arg6[%c0_123, %c0_124] : memref<8x4xbf16, #tpu.memory_space<vmem>>, vector<8x4xbf16>
    %146 = arith.truncf %144 : vector<4x384xf32> to vector<4x384xbf16>
    %cst_125 = arith.constant dense<0.000000e+00> : vector<8x384xf32>
    %147 = tpu.matmul %145, %146, %cst_125 {dimension_numbers = #tpu.dot_dimension_numbers<[1], [0], [0], [1], [0, 0, 1, 1], [], []>} : vector<8x4xbf16>, vector<4x384xbf16>, vector<8x384xf32> -> vector<8x384xf32>
    %c0_126 = arith.constant 0 : index
    %c0_127 = arith.constant 0 : index
    %148 = vector.load %arg7[%c0_126, %c0_127] : memref<8x1xf32, #tpu.memory_space<vmem>>, vector<8x1xf32>
    %149 = vector.broadcast %148 : vector<8x1xf32> to vector<8x384xf32>
    %150 = arith.addf %147, %149 : vector<8x384xf32>
    %151 = arith.addf %131, %150 : vector<8x384xf32>
    %cst_128 = arith.constant 0.000000e+00 : f32
    %152 = vector.broadcast %cst_128 : f32 to vector<8x384xf32>
    %153 = arith.cmpf oge, %151, %152 : vector<8x384xf32>
    %cst_129 = arith.constant 1.000000e-01 : f32
    %154 = vector.broadcast %cst_129 : f32 to vector<8x384xf32>
    %155 = arith.mulf %154, %151 : vector<8x384xf32>
    %156 = arith.select %153, %151, %155 : vector<8x384xi1>, vector<8x384xf32>
    %cst_130 = arith.constant 4.000000e-01 : f32
    %157 = vector.broadcast %cst_130 : f32 to vector<8x384xf32>
    %158 = arith.subf %156, %157 : vector<8x384xf32>
    %cst_131 = arith.constant 0.000000e+00 : f32
    %159 = vector.broadcast %cst_131 : f32 to vector<8x64xf32>
    %c0_132 = arith.constant 0 : index
    %c0_133 = arith.constant 0 : index
    %c64 = arith.constant 64 : index
    %160 = vector.load %arg10[%c0_132, %c0_133, %c64] : memref<1x8x128xf32, #tpu.memory_space<vmem>>, vector<1x8x64xf32>
    %161 = vector.shape_cast %160 : vector<1x8x64xf32> to vector<8x64xf32>
    %162 = vector.shape_cast %159 : vector<8x64xf32> to vector<1x8x64xf32>
    tpu.vector_store %arg10[%c0_132, %c0_133, %c64], %162 {strides = array<i32>} : memref<1x8x128xf32, #tpu.memory_space<vmem>>, vector<1x8x64xf32>,
    %163 = vector.extract_strided_slice %158 {offsets = [0, 0], sizes = [8, 16], strides = [1, 1]} : vector<8x384xf32> to vector<8x16xf32>
    %c0_134 = arith.constant 0 : index
    %c0_135 = arith.constant 0 : index
    %164 = vector.load %arg9[%c0_134, %c0_135] : memref<16x8xf32, #tpu.memory_space<vmem>>, vector<16x8xf32>
    %cst_136 = arith.constant dense<0.000000e+00> : vector<8x8xf32>
    %165 = tpu.matmul %163, %164, %cst_136 {dimension_numbers = #tpu.dot_dimension_numbers<[1], [0], [0], [1], [0, 0, 1, 1], [], []>} : vector<8x16xf32>, vector<16x8xf32>, vector<8x8xf32> -> vector<8x8xf32>
    %c0_137 = arith.constant 0 : index
    %c0_138 = arith.constant 0 : index
    %c0_139 = arith.constant 0 : index
    %166 = vector.load %arg10[%c0_137, %c0_138, %c0_139] : memref<1x8x128xf32, #tpu.memory_space<vmem>>, vector<1x8x8xf32>
    %167 = vector.shape_cast %166 : vector<1x8x8xf32> to vector<8x8xf32>
    %168 = vector.shape_cast %165 : vector<8x8xf32> to vector<1x8x8xf32>
    tpu.vector_store %arg10[%c0_137, %c0_138, %c0_139], %168 {strides = array<i32>} : memref<1x8x128xf32, #tpu.memory_space<vmem>>, vector<1x8x8xf32>,
    %169 = vector.extract_strided_slice %158 {offsets = [0, 36], sizes = [8, 16], strides = [1, 1]} : vector<8x384xf32> to vector<8x16xf32>
    %c0_140 = arith.constant 0 : index
    %c0_141 = arith.constant 0 : index
    %170 = vector.load %arg9[%c0_140, %c0_141] : memref<16x8xf32, #tpu.memory_space<vmem>>, vector<16x8xf32>
    %cst_142 = arith.constant dense<0.000000e+00> : vector<8x8xf32>
    %171 = tpu.matmul %169, %170, %cst_142 {dimension_numbers = #tpu.dot_dimension_numbers<[1], [0], [0], [1], [0, 0, 1, 1], [], []>} : vector<8x16xf32>, vector<16x8xf32>, vector<8x8xf32> -> vector<8x8xf32>
    %c0_143 = arith.constant 0 : index
    %c0_144 = arith.constant 0 : index
    %c8_145 = arith.constant 8 : index
    %172 = vector.load %arg10[%c0_143, %c0_144, %c8_145] : memref<1x8x128xf32, #tpu.memory_space<vmem>>, vector<1x8x8xf32>
    %173 = vector.shape_cast %172 : vector<1x8x8xf32> to vector<8x8xf32>
    %174 = vector.shape_cast %171 : vector<8x8xf32> to vector<1x8x8xf32>
    tpu.vector_store %arg10[%c0_143, %c0_144, %c8_145], %174 {strides = array<i32>} : memref<1x8x128xf32, #tpu.memory_space<vmem>>, vector<1x8x8xf32>,
    %175 = vector.extract_strided_slice %158 {offsets = [0, 72], sizes = [8, 16], strides = [1, 1]} : vector<8x384xf32> to vector<8x16xf32>
    %c0_146 = arith.constant 0 : index
    %c0_147 = arith.constant 0 : index
    %176 = vector.load %arg9[%c0_146, %c0_147] : memref<16x8xf32, #tpu.memory_space<vmem>>, vector<16x8xf32>
    %cst_148 = arith.constant dense<0.000000e+00> : vector<8x8xf32>
    %177 = tpu.matmul %175, %176, %cst_148 {dimension_numbers = #tpu.dot_dimension_numbers<[1], [0], [0], [1], [0, 0, 1, 1], [], []>} : vector<8x16xf32>, vector<16x8xf32>, vector<8x8xf32> -> vector<8x8xf32>
    %c0_149 = arith.constant 0 : index
    %c0_150 = arith.constant 0 : index
    %c16 = arith.constant 16 : index
    %178 = vector.load %arg10[%c0_149, %c0_150, %c16] : memref<1x8x128xf32, #tpu.memory_space<vmem>>, vector<1x8x8xf32>
    %179 = vector.shape_cast %178 : vector<1x8x8xf32> to vector<8x8xf32>
    %180 = vector.shape_cast %177 : vector<8x8xf32> to vector<1x8x8xf32>
    tpu.vector_store %arg10[%c0_149, %c0_150, %c16], %180 {strides = array<i32>} : memref<1x8x128xf32, #tpu.memory_space<vmem>>, vector<1x8x8xf32>,
    %181 = vector.extract_strided_slice %158 {offsets = [0, 108], sizes = [8, 16], strides = [1, 1]} : vector<8x384xf32> to vector<8x16xf32>
    %c0_151 = arith.constant 0 : index
    %c0_152 = arith.constant 0 : index
    %182 = vector.load %arg9[%c0_151, %c0_152] : memref<16x8xf32, #tpu.memory_space<vmem>>, vector<16x8xf32>
    %cst_153 = arith.constant dense<0.000000e+00> : vector<8x8xf32>
    %183 = tpu.matmul %181, %182, %cst_153 {dimension_numbers = #tpu.dot_dimension_numbers<[1], [0], [0], [1], [0, 0, 1, 1], [], []>} : vector<8x16xf32>, vector<16x8xf32>, vector<8x8xf32> -> vector<8x8xf32>
    %c0_154 = arith.constant 0 : index
    %c0_155 = arith.constant 0 : index
    %c24 = arith.constant 24 : index
    %184 = vector.load %arg10[%c0_154, %c0_155, %c24] : memref<1x8x128xf32, #tpu.memory_space<vmem>>, vector<1x8x8xf32>
    %185 = vector.shape_cast %184 : vector<1x8x8xf32> to vector<8x8xf32>
    %186 = vector.shape_cast %183 : vector<8x8xf32> to vector<1x8x8xf32>
    tpu.vector_store %arg10[%c0_154, %c0_155, %c24], %186 {strides = array<i32>} : memref<1x8x128xf32, #tpu.memory_space<vmem>>, vector<1x8x8xf32>,
    %187 = vector.extract_strided_slice %158 {offsets = [0, 144], sizes = [8, 16], strides = [1, 1]} : vector<8x384xf32> to vector<8x16xf32>
    %c0_156 = arith.constant 0 : index
    %c0_157 = arith.constant 0 : index
    %188 = vector.load %arg9[%c0_156, %c0_157] : memref<16x8xf32, #tpu.memory_space<vmem>>, vector<16x8xf32>
    %cst_158 = arith.constant dense<0.000000e+00> : vector<8x8xf32>
    %189 = tpu.matmul %187, %188, %cst_158 {dimension_numbers = #tpu.dot_dimension_numbers<[1], [0], [0], [1], [0, 0, 1, 1], [], []>} : vector<8x16xf32>, vector<16x8xf32>, vector<8x8xf32> -> vector<8x8xf32>
    %c0_159 = arith.constant 0 : index
    %c0_160 = arith.constant 0 : index
    %c32 = arith.constant 32 : index
    %190 = vector.load %arg10[%c0_159, %c0_160, %c32] : memref<1x8x128xf32, #tpu.memory_space<vmem>>, vector<1x8x8xf32>
    %191 = vector.shape_cast %190 : vector<1x8x8xf32> to vector<8x8xf32>
    %192 = vector.shape_cast %189 : vector<8x8xf32> to vector<1x8x8xf32>
    tpu.vector_store %arg10[%c0_159, %c0_160, %c32], %192 {strides = array<i32>} : memref<1x8x128xf32, #tpu.memory_space<vmem>>, vector<1x8x8xf32>,
    %193 = vector.extract_strided_slice %158 {offsets = [0, 180], sizes = [8, 16], strides = [1, 1]} : vector<8x384xf32> to vector<8x16xf32>
    %c0_161 = arith.constant 0 : index
    %c0_162 = arith.constant 0 : index
    %194 = vector.load %arg9[%c0_161, %c0_162] : memref<16x8xf32, #tpu.memory_space<vmem>>, vector<16x8xf32>
    %cst_163 = arith.constant dense<0.000000e+00> : vector<8x8xf32>
    %195 = tpu.matmul %193, %194, %cst_163 {dimension_numbers = #tpu.dot_dimension_numbers<[1], [0], [0], [1], [0, 0, 1, 1], [], []>} : vector<8x16xf32>, vector<16x8xf32>, vector<8x8xf32> -> vector<8x8xf32>
    %c0_164 = arith.constant 0 : index
    %c0_165 = arith.constant 0 : index
    %c40 = arith.constant 40 : index
    %196 = vector.load %arg10[%c0_164, %c0_165, %c40] : memref<1x8x128xf32, #tpu.memory_space<vmem>>, vector<1x8x8xf32>
    %197 = vector.shape_cast %196 : vector<1x8x8xf32> to vector<8x8xf32>
    %198 = vector.shape_cast %195 : vector<8x8xf32> to vector<1x8x8xf32>
    tpu.vector_store %arg10[%c0_164, %c0_165, %c40], %198 {strides = array<i32>} : memref<1x8x128xf32, #tpu.memory_space<vmem>>, vector<1x8x8xf32>,
    %199 = vector.extract_strided_slice %158 {offsets = [0, 216], sizes = [8, 16], strides = [1, 1]} : vector<8x384xf32> to vector<8x16xf32>
    %c0_166 = arith.constant 0 : index
    %c0_167 = arith.constant 0 : index
    %200 = vector.load %arg9[%c0_166, %c0_167] : memref<16x8xf32, #tpu.memory_space<vmem>>, vector<16x8xf32>
    %cst_168 = arith.constant dense<0.000000e+00> : vector<8x8xf32>
    %201 = tpu.matmul %199, %200, %cst_168 {dimension_numbers = #tpu.dot_dimension_numbers<[1], [0], [0], [1], [0, 0, 1, 1], [], []>} : vector<8x16xf32>, vector<16x8xf32>, vector<8x8xf32> -> vector<8x8xf32>
    %c0_169 = arith.constant 0 : index
    %c0_170 = arith.constant 0 : index
    %c48 = arith.constant 48 : index
    %202 = vector.load %arg10[%c0_169, %c0_170, %c48] : memref<1x8x128xf32, #tpu.memory_space<vmem>>, vector<1x8x8xf32>
    %203 = vector.shape_cast %202 : vector<1x8x8xf32> to vector<8x8xf32>
    %204 = vector.shape_cast %201 : vector<8x8xf32> to vector<1x8x8xf32>
    tpu.vector_store %arg10[%c0_169, %c0_170, %c48], %204 {strides = array<i32>} : memref<1x8x128xf32, #tpu.memory_space<vmem>>, vector<1x8x8xf32>,
    %205 = vector.extract_strided_slice %158 {offsets = [0, 252], sizes = [8, 16], strides = [1, 1]} : vector<8x384xf32> to vector<8x16xf32>
    %c0_171 = arith.constant 0 : index
    %c0_172 = arith.constant 0 : index
    %206 = vector.load %arg9[%c0_171, %c0_172] : memref<16x8xf32, #tpu.memory_space<vmem>>, vector<16x8xf32>
    %cst_173 = arith.constant dense<0.000000e+00> : vector<8x8xf32>
    %207 = tpu.matmul %205, %206, %cst_173 {dimension_numbers = #tpu.dot_dimension_numbers<[1], [0], [0], [1], [0, 0, 1, 1], [], []>} : vector<8x16xf32>, vector<16x8xf32>, vector<8x8xf32> -> vector<8x8xf32>
    %c0_174 = arith.constant 0 : index
    %c0_175 = arith.constant 0 : index
    %c56 = arith.constant 56 : index
    %208 = vector.load %arg10[%c0_174, %c0_175, %c56] : memref<1x8x128xf32, #tpu.memory_space<vmem>>, vector<1x8x8xf32>
    %209 = vector.shape_cast %208 : vector<1x8x8xf32> to vector<8x8xf32>
    %210 = vector.shape_cast %207 : vector<8x8xf32> to vector<1x8x8xf32>
    tpu.vector_store %arg10[%c0_174, %c0_175, %c56], %210 {strides = array<i32>} : memref<1x8x128xf32, #tpu.memory_space<vmem>>, vector<1x8x8xf32>,
    return
  }
  func.func @transform_0(%arg0: i32) -> (i32, i32, i32) {
    %c0_i32 = arith.constant 0 : i32
    %c0_i32_0 = arith.constant 0 : i32
    %c0_i32_1 = arith.constant 0 : i32
    return %arg0, %c0_i32, %c0_i32_0 : i32, i32, i32
  }
  func.func @transform_1(%arg0: i32) -> (i32, i32, i32) {
    %c0_i32 = arith.constant 0 : i32
    %c0_i32_0 = arith.constant 0 : i32
    %c0_i32_1 = arith.constant 0 : i32
    %c0_i32_2 = arith.constant 0 : i32
    return %c0_i32, %c0_i32_0, %c0_i32_1 : i32, i32, i32
  }
  func.func @transform_2(%arg0: i32) -> (i32, i32) {
    %c0_i32 = arith.constant 0 : i32
    %c0_i32_0 = arith.constant 0 : i32
    %c0_i32_1 = arith.constant 0 : i32
    return %c0_i32, %c0_i32_0 : i32, i32
  }
  func.func @transform_3(%arg0: i32) -> (i32, i32, i32) {
    %c0_i32 = arith.constant 0 : i32
    %c0_i32_0 = arith.constant 0 : i32
    %c0_i32_1 = arith.constant 0 : i32
    %c0_i32_2 = arith.constant 0 : i32
    return %c0_i32, %c0_i32_0, %c0_i32_1 : i32, i32, i32
  }
  func.func @transform_4(%arg0: i32) -> (i32, i32) {
    %c0_i32 = arith.constant 0 : i32
    %c0_i32_0 = arith.constant 0 : i32
    %c0_i32_1 = arith.constant 0 : i32
    return %c0_i32, %c0_i32_0 : i32, i32
  }
  func.func @transform_5(%arg0: i32) -> (i32, i32) {
    %c0_i32 = arith.constant 0 : i32
    %c0_i32_0 = arith.constant 0 : i32
    %c0_i32_1 = arith.constant 0 : i32
    return %c0_i32, %c0_i32_0 : i32, i32
  }
  func.func @transform_6(%arg0: i32) -> (i32, i32) {
    %c0_i32 = arith.constant 0 : i32
    %c0_i32_0 = arith.constant 0 : i32
    %c0_i32_1 = arith.constant 0 : i32
    return %c0_i32, %c0_i32_0 : i32, i32
  }
  func.func @transform_7(%arg0: i32) -> (i32, i32) {
    %c0_i32 = arith.constant 0 : i32
    %c0_i32_0 = arith.constant 0 : i32
    %c0_i32_1 = arith.constant 0 : i32
    return %c0_i32, %c0_i32_0 : i32, i32
  }
  func.func @transform_8(%arg0: i32) -> (i32, i32) {
    %c0_i32 = arith.constant 0 : i32
    %c0_i32_0 = arith.constant 0 : i32
    %c0_i32_1 = arith.constant 0 : i32
    return %c0_i32, %c0_i32_0 : i32, i32
  }
  func.func @transform_9(%arg0: i32) -> (i32, i32, i32) {
    %c0_i32 = arith.constant 0 : i32
    %c0_i32_0 = arith.constant 0 : i32
    %c0_i32_1 = arith.constant 0 : i32
    return %arg0, %c0_i32, %c0_i32_0 : i32, i32, i32
  }
}

</mosaic_0001>

<bundles_post_ra>
// kernel: tpu_custom_call.1
= control target key start
LH: loop header
LB: loop body
LE: loop exit
PB: predicated region body
PF: predicated region fallthrough
CT: control target
= control target key end

     0   :  { %14 = vsyncpa [#allocation4], 0  ;;  %s4573_s0 = inlined_call_operand.vmem [shape: f32[2,4,512], index: 0, kind: input, shape index: {}]   ;;  %s4574_s1 = inlined_call_operand.vmem [shape: bf16[9,8,4], index: 1, kind: input, shape index: {}]   ;;  %s4575_s2 = inlined_call_operand.vmem [shape: f32[8,1], index: 2, kind: input, shape index: {}]   ;;  %s4576_s3 = inlined_call_operand.vmem [shape: bf16[9,8,8], index: 3, kind: input, shape index: {}]   ;;  %s4577_s4 = inlined_call_operand.vmem [shape: f32[8,1], index: 4, kind: input, shape index: {}]   ;;  %s4578_s5 = inlined_call_operand.vmem [shape: bf16[8,4], index: 5, kind: input, shape index: {}]   ;;  %s4579_s6 = inlined_call_operand.vmem [shape: f32[8,1], index: 6, kind: input, shape index: {}]   ;;  %s4580_s7 = inlined_call_operand.vmem [shape: f32[1,384], index: 7, kind: input, shape index: {}]   ;;  %s4581_s8 = inlined_call_operand.vmem [shape: f32[16,8], index: 8, kind: input, shape index: {}]   ;;  %s4582_s9 = inlined_call_operand.hbm [shape: f32[2,8,128], index: 9, kind: output, shape index: {}]  }
   0x1   :  { %16 = vsyncpa [#allocation4 + $0x1], 0  ;;  %s3996_s30 = smov 0   ;;  %s3998_s10 = smov 0  }
   0x2   :  { %s4000_s11 = smov 0   ;;  %s4002_s12 = smov 0  }
   0x3 LB: > { %s4017_s13 = sadd.s32 4294967295, %s3916_s12   ;;  %s3431_s14 = sadd.s32 4294967294, %s3916_s12   ;;  %s3916_s12 = sphi %s4002_s12, %s4588_s12   ;;  %s3912_s11 = sphi %s4000_s11, %s4587_s11   ;;  %s3908_s10 = sphi %s3998_s10, %s4586_s10   ;;  %s3904_s30 = sphi %s3996_s30, %s4585_s30  }
   0x4   : > { %s4021_s15 = sadd.s32 1, %s3916_s12   ;;  %s223_s16 = sadd.s32 1, %s3912_s11 }
   0x5   : > { %s220_s17 = ssub.s32 %s3916_s12, %s4021_s15  ;;  %p233_p0 = scmp.ne.s32.totalorder %s3912_s11, %s3908_s10 }
   0x6   : > { %p221_p1 = scmp.eq.s32.totalorder %s220_s17, 0  ;;  %p234_p2 = scmp.eq.s32.totalorder %s4017_s13, 1 }
   0x7   : > { %p239_p3 = scmp.ne.s32.totalorder %s3908_s10, %s3904_s30  ;;  %p240_p4 = scmp.eq.s32.totalorder %s3431_s14, 1 }
   0x8   : > { %s4032_s18 = scalar_select %p221_p1, %s3912_s11, %s223_s16  }
   0x9   : > { %p4034_p5 = por %p234_p2, %p233_p0  ;;  %p4038_p6 = por %p240_p4, %p239_p3 }
   0xa   : > { %p3434_p7 = scmp.ge.s32.totalorder %s3916_s12, 1  ;;  %p290_p8 = scmp.lt.s32.totalorder %s3916_s12, 3 }
   0xc   : > { %p291_p9 = pnand %p3434_p7, %p290_p8 }
   0xd   : > { %p326_p10 = scmp.lt.s32.totalorder (!%p291_p9), %s4017_s13, 1  ;;  %s3921_s26 = smov (!%p291_p9), 127  }
   0xe   : > { %294 = sbr.rel (%p291_p9) target bundleno = 1344 (0x540), region = 56  ;;  %s3922_s27 = smov (!%p291_p9), 126  }
   0xf   : > { %s3923_s28 = smov (!%p291_p9), 110   ;;  %s3924_s29 = smov (!%p291_p9), 109  }
  0x10   : > { %s3925_s14 = smov (!%p291_p9), 108   ;;  %s3926_s16 = smov (!%p291_p9), 92  }
  0x11   : > { %s3927_s17 = smov (!%p291_p9), 91   ;;  %s3932_s23 = smov (!%p291_p9), 1  }
  0x12   : > { %s3933_s24 = smov (!%p291_p9), 111  }
  0x13   : > { %v3918_v0 = vmov 0.0   ;;  %s327_s21 = scalar_select %p326_p10, %s4017_s13, 1  ;;  %v3919_v1 = vmov 0   ;;  %vm3920_vm0 = vmmov 0   ;;  %v1441_v10 = vld [vmem:[%s4575_s2] sm:$0xff]  ;;  %vm367_vm1 = vcmask 1039360  }
  0x14   : > { %3607 = vmatprep.subr.bf16.mxu1 %v3918_v0  ;;  %417 = vmatprep.mubr.bf16.mxu0 %v3919_v1  ;;  %1482 = vst [vmem:[#allocation2] sm:$0xf] %v3919_v1  ;;  %1483 = vst [vmem:[#allocation2 + $0x10] sm:$0xf] %v3919_v1  ;;  %vm375_vm2 = vcmask 1041408   ;;  %vm371_vm3 = vcmask 31744  }
  0x15   : > { %3609 = vmatprep.mubr.msk.bf16.mxu1 %vm3920_vm0, %v3918_v0  ;;  %s3542_s22 = sshll.u32 %s327_s21, 4  ;;  %3843 = vset.pattern.permute.xlu0 %v3919_v1  ;;  %s3928_s21 = smov 90   ;;  %v3438_v22 = vld [vmem:[%s4574_s1 + $0x4] sm:$0xf]  ;;  %vm585_vm4 = vcmask 1031168   ;;  %vm711_vm5 = vcmask 900096  }
  0x16   : > { %3844 = vset.pattern.permute.xlu1 %v3919_v1  ;;  %s4057_s25 = scalar_lea.vmem %s4573_s0, %s3542_s22  ;;  %v332_v32 = vld [vmem:[%s4574_s1] sm:$0xf]  ;;  %v3445_v42 = vld [vmem:[%s4574_s1 + $0x8] sm:$0xf]  ;;  %vm837_vm6 = vcmask 891904   ;;  %vm963_vm7 = vcmask 883712  }
  0x17   : > { %v4060_v2 = vld [vmem:[%s4057_s25 + $0x8] sm:$0xff]  ;;  %v4063_v3 = vld [vmem:[%s4057_s25] sm:$0xff]  ;;  %v3453_v62 = vld [vmem:[%s4574_s1 + $0x10] sm:$0xf]  ;;  %vm1089_vm8 = vcmask 752640   ;;  %vm1215_vm9 = vcmask 744448  }
  0x18   : > { %v353_v4 = vpack.c.bf16 %v4060_v2, %v4060_v2  ;;  %v348_v5 = vcombine.high %v4060_v2, %v4060_v2  ;;  %v4071_v6 = vpack.c.bf16 %v4063_v3, %v4063_v3  ;;  %v347_v7 = vcombine.high %v4063_v3, %v4063_v3  ;;  %v334_v13 = vld [vmem:[%s4057_s25 + $0x8] sm:$0xf]  ;;  %v3449_v52 = vld [vmem:[%s4574_s1 + $0xc] sm:$0xf]  ;;  %s3931_s22 = smov 17   ;;  %s3939_s25 = smov 4  }
  0x19   : > { %v340_v16 = vpack.c.bf16 %v334_v13, %v334_v13  ;;  %vm1341_vm10 = vcmask 736256   ;;  %vm1530_vm14 = vcmask 1043456   ;;  %vm1522_vm15 = vcmask 146432  }
  0x1a   : > { %363 = vrot.lane.b32.xlu1 %v353_v4, %s3921_s26  ;;  %359 = vrot.lane.b32.xlu0 %v4071_v6, %s3921_s26  ;;  %v354_v8 = vpack.c.bf16 %v348_v5, %v348_v5  ;;  %v4078_v9 = vpack.c.bf16 %v347_v7, %v347_v7  ;;  %v470_v24 = vsel %vm375_vm2, %v4071_v6, 0 }
  0x1b   : > { %v476_v25 = vsel %vm375_vm2, %v340_v16, 0 }
  0x1e   : > { %365 = vrot.lane.b32.xlu1 %v354_v8, %s3921_s26  ;;  %361 = vrot.lane.b32.xlu0 %v4078_v9, %s3921_s26 }
  0x22   : > { %577 = vrot.lane.b32.xlu0 %v4071_v6, %s3922_s27  ;;  %579 = vrot.lane.b32.xlu1 %v4078_v9, %s3922_s27 }
  0x26   : > { %581 = vrot.lane.b32.xlu0 %v353_v4, %s3922_s27  ;;  %583 = vrot.lane.b32.xlu1 %v354_v8, %s3922_s27  ;;  %s3940_s27 = smov 8  }
  0x2a   : > { %703 = vrot.lane.b32.xlu0 %v4071_v6, %s3923_s28  ;;  %705 = vrot.lane.b32.xlu1 %v4078_v9, %s3923_s28 }
  0x2e   : > { %707 = vrot.lane.b32.xlu0 %v353_v4, %s3923_s28  ;;  %709 = vrot.lane.b32.xlu1 %v354_v8, %s3923_s28 }
  0x32   : > { %829 = vrot.lane.b32.xlu0 %v4071_v6, %s3924_s29  ;;  %831 = vrot.lane.b32.xlu1 %v4078_v9, %s3924_s29 }
  0x36   : > { %833 = vrot.lane.b32.xlu0 %v353_v4, %s3924_s29  ;;  %835 = vrot.lane.b32.xlu1 %v354_v8, %s3924_s29 }
  0x3a   : > { %955 = vrot.lane.b32.xlu0 %v4071_v6, %s3925_s14  ;;  %957 = vrot.lane.b32.xlu1 %v4078_v9, %s3925_s14 }
  0x3e   : > { %959 = vrot.lane.b32.xlu0 %v353_v4, %s3925_s14  ;;  %961 = vrot.lane.b32.xlu1 %v354_v8, %s3925_s14  ;;  %s3941_s14 = smov 16  }
  0x42   : > { %1081 = vrot.lane.b32.xlu0 %v4071_v6, %s3926_s16  ;;  %1083 = vrot.lane.b32.xlu1 %v4078_v9, %s3926_s16 }
  0x46   : > { %1085 = vrot.lane.b32.xlu0 %v353_v4, %s3926_s16  ;;  %1087 = vrot.lane.b32.xlu1 %v354_v8, %s3926_s16 }
  0x4a   : > { %1207 = vrot.lane.b32.xlu0 %v4071_v6, %s3927_s17  ;;  %1209 = vrot.lane.b32.xlu1 %v4078_v9, %s3927_s17 }
  0x4e   : > { %1211 = vrot.lane.b32.xlu0 %v353_v4, %s3927_s17  ;;  %1213 = vrot.lane.b32.xlu1 %v354_v8, %s3927_s17  ;;  %s3929_s17 = smov 18  }
  0x52   : > { %1333 = vrot.lane.b32.xlu0 %v4071_v6, %s3928_s21  ;;  %1335 = vrot.lane.b32.xlu1 %v4078_v9, %s3928_s21 }
  0x56   : > { %1337 = vrot.lane.b32.xlu0 %v353_v4, %s3928_s21  ;;  %1339 = vrot.lane.b32.xlu1 %v354_v8, %s3928_s21  ;;  %s3930_s21 = smov 19  }
  0x5a   : > { %1444 = vperm.xlu0 %3843, %v1441_v10   ;;  %2516 = vrot.lane.b32.xlu1 %v4063_v3, %s3921_s26 }
  0x5e   : > { %2518 = vrot.lane.b32.xlu1 %v4060_v2, %s3921_s26  ;;  %2532 = vrot.lane.b32.xlu0 %v4060_v2, %s3923_s28 }
  0x62   : > { %2530 = vrot.lane.b32.xlu1 %v4063_v3, %s3923_s28 }
  0x66   : > { %2544 = vrot.lane.b32.xlu1 %v4063_v3, %s3924_s29 }
  0x8c   : > { %v364_v11 = vpop.permute.xlu1 %363  ;;  %v360_v12 = vpop.permute.xlu0 %359 }
  0x90   : > { %v366_v14 = vpop.permute.xlu1 %365  ;;  %v362_v15 = vpop.permute.xlu0 %361 }
  0x91   : > { %v369_v17 = vsel %vm367_vm1, %v362_v15, %v364_v11  ;;  %v368_v18 = vsel %vm367_vm1, %v360_v12, %v362_v15  ;;  %v370_v19 = vsel %vm367_vm1, %v364_v11, %v366_v14  ;;  %v3457_v12 = vld [vmem:[%s4574_s1 + $0x14] sm:$0xf] }
  0x92   : > { %3439 = vmatprep.subr.msk.bf16.mxu0 %vm375_vm2, %v369_v17  ;;  %v377_v20 = vsel %vm375_vm2, %v368_v18, 0  ;;  %v383_v21 = vsel %vm375_vm2, %v370_v19, 0 }
  0x93   : > { %400 = vmatpush1.bf16.msra.mxu0 %v377_v20  ;;  %3608 = vmatpush3.bf16.msra.mxu1 %v383_v21 }
  0x94   : > { %v578_v23 = vpop.permute.xlu0 %577  ;;  %3442 = vmatprep.subr.msk.bf16.mxu0 %vm375_vm2, %v4078_v9  ;;  %3613 = vmatprep.subr.bf16.mxu1 %v3918_v0  ;;  %v580_v26 = vpop.permute.xlu1 %579 }
  0x95   : > { %v586_v29 = vsel %vm585_vm4, %v578_v23, %v580_v26 }
  0x96   : > { %3440 = vmatmul.mubr.msk.bf16.vlgmr.msra.gmra.mxu0 %vm371_vm3, %v3438_v22  ;;  %3610 = vmatmul.mubr.msk.bf16.vlgmr.msra.gmra.mxu1 %vm371_vm3, %v3438_v22  ;;  %v593_v33 = vsel %vm375_vm2, %v586_v29, 0  ;;  %v3461_v22 = vld [vmem:[%s4574_s1 + $0x18] sm:$0xf] }
  0x97   : > { %493 = vmatpush1.bf16.msra.mxu0 %v470_v24  ;;  %3614 = vmatpush3.bf16.msra.mxu1 %v476_v25 }
  0x98   : > { %v582_v27 = vpop.permute.xlu0 %581  ;;  %510 = vmatprep.mubr.bf16.mxu0 %v3919_v1  ;;  %3615 = vmatprep.mubr.msk.bf16.mxu1 %vm3920_vm0, %v3918_v0  ;;  %v584_v28 = vpop.permute.xlu1 %583 }
  0x99   : > { %v587_v30 = vsel %vm585_vm4, %v580_v26, %v582_v27  ;;  %v588_v31 = vsel %vm585_vm4, %v582_v27, %v584_v28  ;;  %3619 = vmatprep.subr.bf16.mxu1 %v3918_v0  ;;  %vm1526_vm4 = vcmask 64512  }
  0x9a   : > { %3446 = vmatprep.subr.msk.bf16.mxu0 %vm375_vm2, %v587_v30  ;;  %v599_v34 = vsel %vm375_vm2, %v588_v31, 0 }
  0x9c   : > { %v704_v35 = vpop.permute.xlu0 %703  ;;  %v706_v36 = vpop.permute.xlu1 %705 }
  0x9d   : > { %v712_v39 = vsel %vm711_vm5, %v704_v35, %v706_v36  ;;  %v3469_v35 = vld [vmem:[%s4574_s1 + $0x20] sm:$0xf] }
  0x9e   : > { %3443 = vmatmul.mubr.msk.bf16.vlgmr.msra.gmra.mxu0 %vm371_vm3, %v332_v32  ;;  %3616 = vmatmul.mubr.msk.bf16.vlgmr.msra.gmra.mxu1 %vm371_vm3, %v332_v32  ;;  %v719_v43 = vsel %vm375_vm2, %v712_v39, 0  ;;  %v3465_v32 = vld [vmem:[%s4574_s1 + $0x1c] sm:$0xf] }
  0x9f   : > { %616 = vmatpush1.bf16.msra.mxu0 %v593_v33  ;;  %3620 = vmatpush3.bf16.msra.mxu1 %v599_v34 }
  0xa0   : > { %v708_v37 = vpop.permute.xlu0 %707  ;;  %633 = vmatprep.mubr.bf16.mxu0 %v3919_v1  ;;  %3621 = vmatprep.mubr.msk.bf16.mxu1 %vm3920_vm0, %v3918_v0  ;;  %v710_v38 = vpop.permute.xlu1 %709 }
  0xa1   : > { %v713_v40 = vsel %vm711_vm5, %v706_v36, %v708_v37  ;;  %v714_v41 = vsel %vm711_vm5, %v708_v37, %v710_v38  ;;  %3625 = vmatprep.subr.bf16.mxu1 %v3918_v0 }
  0xa2   : > { %3450 = vmatprep.subr.msk.bf16.mxu0 %vm375_vm2, %v713_v40  ;;  %v725_v44 = vsel %vm375_vm2, %v714_v41, 0 }
  0xa4   : > { %v830_v45 = vpop.permute.xlu0 %829  ;;  %v832_v46 = vpop.permute.xlu1 %831 }
  0xa5   : > { %v838_v49 = vsel %vm837_vm6, %v830_v45, %v832_v46 }
  0xa6   : > { %3447 = vmatmul.mubr.msk.bf16.vlgmr.msra.gmra.mxu0 %vm371_vm3, %v3445_v42  ;;  %3622 = vmatmul.mubr.msk.bf16.vlgmr.msra.gmra.mxu1 %vm371_vm3, %v3445_v42  ;;  %v845_v53 = vsel %vm375_vm2, %v838_v49, 0 }
  0xa7   : > { %742 = vmatpush1.bf16.msra.mxu0 %v719_v43  ;;  %3626 = vmatpush3.bf16.msra.mxu1 %v725_v44 }
  0xa8   : > { %v834_v47 = vpop.permute.xlu0 %833  ;;  %759 = vmatprep.mubr.bf16.mxu0 %v3919_v1  ;;  %3627 = vmatprep.mubr.msk.bf16.mxu1 %vm3920_vm0, %v3918_v0  ;;  %v836_v48 = vpop.permute.xlu1 %835 }
  0xa9   : > { %v839_v50 = vsel %vm837_vm6, %v832_v46, %v834_v47  ;;  %v840_v51 = vsel %vm837_vm6, %v834_v47, %v836_v48  ;;  %3631 = vmatprep.subr.bf16.mxu1 %v3918_v0 }
  0xaa   : > { %3454 = vmatprep.subr.msk.bf16.mxu0 %vm375_vm2, %v839_v50  ;;  %v851_v54 = vsel %vm375_vm2, %v840_v51, 0 }
  0xac   : > { %v956_v55 = vpop.permute.xlu0 %955  ;;  %v958_v56 = vpop.permute.xlu1 %957 }
  0xad   : > { %v964_v59 = vsel %vm963_vm7, %v956_v55, %v958_v56 }
  0xae   : > { %3451 = vmatmul.mubr.msk.bf16.vlgmr.msra.gmra.mxu0 %vm371_vm3, %v3449_v52  ;;  %3628 = vmatmul.mubr.msk.bf16.vlgmr.msra.gmra.mxu1 %vm371_vm3, %v3449_v52  ;;  %v971_v63 = vsel %vm375_vm2, %v964_v59, 0 }
  0xaf   : > { %868 = vmatpush1.bf16.msra.mxu0 %v845_v53  ;;  %3632 = vmatpush3.bf16.msra.mxu1 %v851_v54 }
  0xb0   : > { %v960_v57 = vpop.permute.xlu0 %959  ;;  %885 = vmatprep.mubr.bf16.mxu0 %v3919_v1  ;;  %3633 = vmatprep.mubr.msk.bf16.mxu1 %vm3920_vm0, %v3918_v0  ;;  %v962_v58 = vpop.permute.xlu1 %961 }
  0xb1   : > { %v965_v60 = vsel %vm963_vm7, %v958_v56, %v960_v57  ;;  %v966_v61 = vsel %vm963_vm7, %v960_v57, %v962_v58  ;;  %3637 = vmatprep.subr.bf16.mxu1 %v3918_v0  ;;  %vm1629_vm7 = vcmask 154624  }
  0xb2   : > { %3458 = vmatprep.subr.msk.bf16.mxu0 %vm375_vm2, %v965_v60  ;;  %v977_v4 = vsel %vm375_vm2, %v966_v61, 0 }
  0xb4   : > { %v1082_v5 = vpop.permute.xlu0 %1081  ;;  %v1084_v6 = vpop.permute.xlu1 %1083 }
  0xb5   : > { %v1090_v9 = vsel %vm1089_vm8, %v1082_v5, %v1084_v6 }
  0xb6   : > { %3455 = vmatmul.mubr.msk.bf16.vlgmr.msra.gmra.mxu0 %vm371_vm3, %v3453_v62  ;;  %3634 = vmatmul.mubr.msk.bf16.vlgmr.msra.gmra.mxu1 %vm371_vm3, %v3453_v62  ;;  %v1097_v13 = vsel %vm375_vm2, %v1090_v9, 0 }
  0xb7   : > { %994 = vmatpush1.bf16.msra.mxu0 %v971_v63  ;;  %3638 = vmatpush3.bf16.msra.mxu1 %v977_v4 }
  0xb8   : > { %v1086_v7 = vpop.permute.xlu0 %1085  ;;  %1011 = vmatprep.mubr.bf16.mxu0 %v3919_v1  ;;  %3639 = vmatprep.mubr.msk.bf16.mxu1 %vm3920_vm0, %v3918_v0  ;;  %v1088_v8 = vpop.permute.xlu1 %1087 }
  0xb9   : > { %v1091_v10 = vsel %vm1089_vm8, %v1084_v6, %v1086_v7  ;;  %v1092_v11 = vsel %vm1089_vm8, %v1086_v7, %v1088_v8  ;;  %3643 = vmatprep.subr.bf16.mxu1 %v3918_v0  ;;  %vm1736_vm8 = vcmask 138240  }
  0xba   : > { %3462 = vmatprep.subr.msk.bf16.mxu0 %vm375_vm2, %v1091_v10  ;;  %v1103_v14 = vsel %vm375_vm2, %v1092_v11, 0 }
  0xbc   : > { %v1208_v15 = vpop.permute.xlu0 %1207  ;;  %v1210_v16 = vpop.permute.xlu1 %1209 }
  0xbd   : > { %v1216_v19 = vsel %vm1215_vm9, %v1208_v15, %v1210_v16 }
  0xbe   : > { %3459 = vmatmul.mubr.msk.bf16.vlgmr.msra.gmra.mxu0 %vm371_vm3, %v3457_v12  ;;  %3640 = vmatmul.mubr.msk.bf16.vlgmr.msra.gmra.mxu1 %vm371_vm3, %v3457_v12  ;;  %v1223_v23 = vsel %vm375_vm2, %v1216_v19, 0 }
  0xbf   : > { %1120 = vmatpush1.bf16.msra.mxu0 %v1097_v13  ;;  %3644 = vmatpush3.bf16.msra.mxu1 %v1103_v14 }
  0xc0   : > { %v1212_v17 = vpop.permute.xlu0 %1211  ;;  %1137 = vmatprep.mubr.bf16.mxu0 %v3919_v1  ;;  %3645 = vmatprep.mubr.msk.bf16.mxu1 %vm3920_vm0, %v3918_v0  ;;  %v1214_v18 = vpop.permute.xlu1 %1213 }
  0xc1   : > { %v1217_v20 = vsel %vm1215_vm9, %v1210_v16, %v1212_v17  ;;  %v1218_v21 = vsel %vm1215_vm9, %v1212_v17, %v1214_v18  ;;  %3649 = vmatprep.subr.bf16.mxu1 %v3918_v0  ;;  %vm1846_vm9 = vcmask 7168  }
  0xc2   : > { %3466 = vmatprep.subr.msk.bf16.mxu0 %vm375_vm2, %v1217_v20  ;;  %v1229_v24 = vsel %vm375_vm2, %v1218_v21, 0 }
  0xc4   : > { %v1334_v25 = vpop.permute.xlu0 %1333  ;;  %v1336_v26 = vpop.permute.xlu1 %1335 }
  0xc5   : > { %v1342_v29 = vsel %vm1341_vm10, %v1334_v25, %v1336_v26 }
  0xc6   : > { %3463 = vmatmul.mubr.msk.bf16.vlgmr.msra.gmra.mxu0 %vm371_vm3, %v3461_v22  ;;  %3646 = vmatmul.mubr.msk.bf16.vlgmr.msra.gmra.mxu1 %vm371_vm3, %v3461_v22  ;;  %v1349_v33 = vsel %vm375_vm2, %v1342_v29, 0 }
  0xc7   : > { %1246 = vmatpush1.bf16.msra.mxu0 %v1223_v23  ;;  %3650 = vmatpush3.bf16.msra.mxu1 %v1229_v24 }
  0xc8   : > { %v1338_v27 = vpop.permute.xlu0 %1337  ;;  %1263 = vmatprep.mubr.bf16.mxu0 %v3919_v1  ;;  %3651 = vmatprep.mubr.msk.bf16.mxu1 %vm3920_vm0, %v3918_v0  ;;  %v1340_v28 = vpop.permute.xlu1 %1339 }
  0xc9   : > { %v1343_v30 = vsel %vm1341_vm10, %v1336_v26, %v1338_v27  ;;  %v1344_v31 = vsel %vm1341_vm10, %v1338_v27, %v1340_v28  ;;  %3655 = vmatprep.subr.bf16.mxu1 %v3918_v0  ;;  %vm2185_vm10 = vcmask 908288  }
  0xca   : > { %3470 = vmatprep.subr.msk.bf16.mxu0 %vm375_vm2, %v1343_v30  ;;  %v1355_v34 = vsel %vm375_vm2, %v1344_v31, 0 }
  0xce   : > { %3467 = vmatmul.mubr.msk.bf16.vlgmr.msra.gmra.mxu0 %vm371_vm3, %v3465_v32  ;;  %3652 = vmatmul.mubr.msk.bf16.vlgmr.msra.gmra.mxu1 %vm371_vm3, %v3465_v32 }
  0xcf   : > { %1372 = vmatpush1.bf16.msra.mxu0 %v1349_v33  ;;  %3656 = vmatpush3.bf16.msra.mxu1 %v1355_v34 }
  0xd0   : > { %1389 = vmatprep.mubr.bf16.mxu0 %v3919_v1  ;;  %3657 = vmatprep.mubr.msk.bf16.mxu1 %vm3920_vm0, %v3918_v0 }
  0xd1   : > { %3661 = vmatprep.subr.bf16.mxu1 %v3918_v0 }
  0xd6   : > { %3471 = vmatmul.mubr.msk.bf16.vlgmr.msra.gmra.mxu0 %vm371_vm3, %v3469_v35  ;;  %3658 = vmatmul.mubr.msk.bf16.vlgmr.msra.gmra.mxu1 %vm371_vm3, %v3469_v35 }
  0xd7   : > { %1572 = vmatprep.mubr.bf16.mxu0 %v3919_v1  ;;  %3663 = vmatprep.mubr.msk.bf16.mxu1 %vm3920_vm0, %v3918_v0 }
 0x156   : > { %v419_v36 = vpop.f32.mrf.mxu0  ;;  %v460_v37 = vpop.f32.mrf.mxu1 }
 0x158   : > { %v421_v38 = vpop.f32.mrf.mxu0  ;;  %v3611_v39 = vpop.f32.mrf.mxu1 }
 0x15a   : > { %v423_v40 = vpop.f32.mrf.mxu0  ;;  %v463_v41 = vpop.f32.mrf.mxu1 }
 0x15c   : > { %v424_v42 = vpop.f32.mrf.mxu0  ;;  %v3612_v43 = vpop.f32.mrf.mxu1 }
 0x15e   : > { %v512_v44 = vpop.f32.mrf.mxu0  ;;  %v553_v45 = vpop.f32.mrf.mxu1 }
 0x15f   : > { %v513_v28 = vadd.f32 %v512_v44, %v419_v36  ;;  %v554_v29 = vadd.f32 %v553_v45, %v460_v37 }
 0x160   : > { %v514_v46 = vpop.f32.mrf.mxu0  ;;  %v3617_v47 = vpop.f32.mrf.mxu1 }
 0x161   : > { %v515_v32 = vadd.f32 %v514_v46, %v421_v38 }
 0x162   : > { %v516_v48 = vpop.f32.mrf.mxu0  ;;  %v556_v49 = vpop.f32.mrf.mxu1 }
 0x164   : > { %v517_v50 = vpop.f32.mrf.mxu0  ;;  %v3618_v51 = vpop.f32.mrf.mxu1 }
 0x166   : > { %v635_v52 = vpop.f32.mrf.mxu0  ;;  %v676_v53 = vpop.f32.mrf.mxu1 }
 0x167   : > { %v682_v33 = vadd.f32 %v635_v52, %v513_v28  ;;  %v684_v34 = vadd.f32 %v676_v53, %v554_v29 }
 0x168   : > { %v637_v54 = vpop.f32.mrf.mxu0  ;;  %v3623_v55 = vpop.f32.mrf.mxu1 }
 0x169   : > { %v683_v40 = vadd.f32 %v637_v54, %v515_v32 }
 0x16a   : > { %v639_v56 = vpop.f32.mrf.mxu0  ;;  %v679_v57 = vpop.f32.mrf.mxu1 }
 0x16b   : > { %v1464_v56 = vlaneseq }
 0x16c   : > { %v640_v58 = vpop.f32.mrf.mxu0  ;;  %v3624_v59 = vpop.f32.mrf.mxu1 }
 0x16d   : > { %v1465_v58 = vshrl.u32 %v1464_v56, 7 }
 0x16e   : > { %v761_v60 = vpop.f32.mrf.mxu0  ;;  %v802_v61 = vpop.f32.mrf.mxu1 }
 0x16f   : > { %v808_v41 = vadd.f32 %v761_v60, %v682_v33  ;;  %v810_v42 = vadd.f32 %v802_v61, %v684_v34 }
 0x170   : > { %v763_v62 = vpop.f32.mrf.mxu0  ;;  %v3629_v63 = vpop.f32.mrf.mxu1 }
 0x171   : > { %v809_v48 = vadd.f32 %v763_v62, %v683_v40  ;;  %v1445_v62 = vpop.permute.xlu0 %1444 }
 0x172   : > { %v765_v4 = vpop.f32.mrf.mxu0  ;;  %v805_v5 = vpop.f32.mrf.mxu1 }
 0x174   : > { %v766_v6 = vpop.f32.mrf.mxu0  ;;  %v3630_v7 = vpop.f32.mrf.mxu1 }
 0x176   : > { %v887_v8 = vpop.f32.mrf.mxu0  ;;  %v928_v9 = vpop.f32.mrf.mxu1 }
 0x177   : > { %v934_v49 = vadd.f32 %v887_v8, %v808_v41  ;;  %v936_v50 = vadd.f32 %v928_v9, %v810_v42  ;;  %v1474_v8 = vsub.s32 2, %v1465_v58 }
 0x178   : > { %v889_v10 = vpop.f32.mrf.mxu0  ;;  %v3635_v11 = vpop.f32.mrf.mxu1 }
 0x179   : > { %v935_v36 = vadd.f32 %v889_v10, %v809_v48  ;;  %v1462_v11 = vld [vmem:[%s4580_s7] sm:$0x7] }
 0x17a   : > { %v891_v12 = vpop.f32.mrf.mxu0  ;;  %v931_v13 = vpop.f32.mrf.mxu1 }
 0x17c   : > { %v892_v14 = vpop.f32.mrf.mxu0  ;;  %v3636_v15 = vpop.f32.mrf.mxu1 }
 0x17e   : > { %v1013_v16 = vpop.f32.mrf.mxu0  ;;  %v1054_v17 = vpop.f32.mrf.mxu1 }
 0x17f   : > { %v1060_v37 = vadd.f32 %v1013_v16, %v934_v49  ;;  %v1062_v44 = vadd.f32 %v1054_v17, %v936_v50 }
 0x180   : > { %v1015_v18 = vpop.f32.mrf.mxu0  ;;  %v3641_v19 = vpop.f32.mrf.mxu1 }
 0x181   : > { %v1061_v46 = vadd.f32 %v1015_v18, %v935_v36  ;;  %v1466_v19 = vsub.s32 0, %v1465_v58 }
 0x182   : > { %v1017_v20 = vpop.f32.mrf.mxu0  ;;  %v1057_v21 = vpop.f32.mrf.mxu1 }
 0x183   : > { %v1475_v20 = vrot.slane %v1462_v11, %v1474_v8  ;;  %v1467_v29 = vrot.slane %v1462_v11, %v1466_v19 }
 0x184   : > { %v1018_v22 = vpop.f32.mrf.mxu0  ;;  %v3642_v23 = vpop.f32.mrf.mxu1 }
 0x185   : > { %v1470_v22 = vsub.s32 1, %v1465_v58 }
 0x186   : > { %v1139_v24 = vpop.f32.mrf.mxu0  ;;  %v1180_v25 = vpop.f32.mrf.mxu1 }
 0x187   : > { %v1186_v52 = vadd.f32 %v1139_v24, %v1060_v37  ;;  %v1188_v53 = vadd.f32 %v1180_v25, %v1062_v44  ;;  %v1471_v32 = vrot.slane %v1462_v11, %v1470_v22  ;;  %v2517_v44 = vpop.permute.xlu1 %2516 }
 0x188   : > { %v1141_v26 = vpop.f32.mrf.mxu0  ;;  %v3647_v27 = vpop.f32.mrf.mxu1 }
 0x189   : > { %v1187_v59 = vadd.f32 %v1141_v26, %v1061_v46 }
 0x18a   : > { %v1143_v30 = vpop.f32.mrf.mxu0  ;;  %v1183_v31 = vpop.f32.mrf.mxu1 }
 0x18c   : > { %v1144_v35 = vpop.f32.mrf.mxu0  ;;  %v3648_v39 = vpop.f32.mrf.mxu1 }
 0x18e   : > { %v1265_v43 = vpop.f32.mrf.mxu0  ;;  %v1306_v47 = vpop.f32.mrf.mxu1 }
 0x18f   : > { %v1312_v60 = vadd.f32 %v1265_v43, %v1186_v52  ;;  %v1314_v61 = vadd.f32 %v1306_v47, %v1188_v53  ;;  %v2533_v52 = vpop.permute.xlu0 %2532  ;;  %v2520_v53 = vrot.slane %v2517_v44, 4 }
 0x190   : > { %v1267_v51 = vpop.f32.mrf.mxu0  ;;  %v3653_v55 = vpop.f32.mrf.mxu1 }
 0x191   : > { %v1313_v5 = vadd.f32 %v1267_v51, %v1187_v59 }
 0x192   : > { %v1269_v45 = vpop.f32.mrf.mxu0  ;;  %v1309_v38 = vpop.f32.mrf.mxu1 }
 0x193   : > { %v2519_v45 = vpop.permute.xlu1 %2518 }
 0x194   : > { %v1270_v57 = vpop.f32.mrf.mxu0  ;;  %v3654_v54 = vpop.f32.mrf.mxu1 }
 0x195   : > { %v2521_v57 = vrot.slane %v2519_v45, 4 }
 0x196   : > { %v1391_v63 = vpop.f32.mrf.mxu0  ;;  %v1432_v4 = vpop.f32.mrf.mxu1 }
 0x197   : > { %v1438_v6 = vadd.f32 %v1391_v63, %v1312_v60  ;;  %v1440_v7 = vadd.f32 %v1432_v4, %v1314_v61  ;;  %v2531_v38 = vpop.permute.xlu1 %2530  ;;  %v2522_v59 = vsel %vm1530_vm14, %v2520_v53, %v2521_v57  ;;  %v2535_v61 = vrot.slane %v2533_v52, 4  ;;  %v2503_v53 = vld [vmem:[%s4577_s4] sm:$0xff] }
 0x198   : > { %v1393_v9 = vpop.f32.mrf.mxu0  ;;  %v3659_v10 = vpop.f32.mrf.mxu1  ;;  %v2534_v60 = vrot.slane %v2531_v38, 4  ;;  %v2524_v63 = vsel %vm367_vm1, %v2517_v44, %v2522_v59  ;;  %v2525_v4 = vsel %vm367_vm1, %v2519_v45, %v2521_v57 }
 0x199   : > { %v1447_v12 = vadd.f32 %v1445_v62, %v1438_v6  ;;  %v1449_v13 = vadd.f32 %v1445_v62, %v1440_v7  ;;  %v1439_v14 = vadd.f32 %v1393_v9, %v1313_v5  ;;  %v2528_v10 = vadd.f32 %v2524_v63, %v4063_v3 }
 0x19a   : > { %v1395_v15 = vpop.f32.mrf.mxu0  ;;  %v1435_v16 = vpop.f32.mrf.mxu1  ;;  %v2536_v7 = vsel %vm1530_vm14, %v2534_v60, %v2535_v61  ;;  %v2529_v11 = vadd.f32 %v2525_v4, %v4060_v2  ;;  %v3493_v60 = vld [vmem:[%s4576_s3 + $0xc] sm:$0xf] }
 0x19b   : > { %vm1450_vm11 = vcmp.ge.f32.partialorder %v1447_v12, 0.0  ;;  %vm1452_vm12 = vcmp.ge.f32.partialorder %v1449_v13, 0.0  ;;  %v1453_v17 = vmul.f32 0.1, %v1447_v12  ;;  %v1455_v18 = vmul.f32 0.1, %v1449_v13  ;;  %v2545_v46 = vpop.permute.xlu1 %2544 }
 0x19c   : > { %v1448_v21 = vadd.f32 %v1445_v62, %v1439_v14  ;;  %v1396_v23 = vpop.f32.mrf.mxu0  ;;  %v3660_v24 = vpop.f32.mrf.mxu1  ;;  %v2538_v14 = vsel %vm711_vm5, %v2531_v38, %v2536_v7  ;;  %v2539_v15 = vsel %vm711_vm5, %v2533_v52, %v2535_v61 }
 0x19d   : > { %v1456_v25 = vsel %vm1450_vm11, %v1447_v12, %v1453_v17  ;;  %v1458_v26 = vsel %vm1452_vm12, %v1449_v13, %v1455_v18  ;;  %v2548_v12 = vrot.slane %v2545_v46, 4  ;;  %v3478_v13 = vld [vmem:[%s4576_s3 + $0x4] sm:$0xf]  ;;  %v2543_v3 = vadd.f32 %v2539_v15, %v2529_v11 }
 0x19e   : > { %v3475_v27 = vadd.f32 -0.4, %v1458_v26  ;;  %vm1451_vm13 = vcmp.ge.f32.partialorder %v1448_v21, 0.0  ;;  %v1454_v28 = vmul.f32 0.1, %v1448_v21  ;;  %vm3023_vm12 = vcmask 261312  }
 0x19f   : > { %v3473_v30 = vadd.f32 -0.4, %v1456_v25 }
 0x1a0   : > { %v1481_v31 = vmul.f32 %v3475_v27, %v1475_v20  ;;  %v1457_v33 = vsel %vm1451_vm13, %v1448_v21, %v1454_v28  ;;  %v2542_v20 = vadd.f32 %v2538_v14, %v2528_v10  ;;  %vm3106_vm13 = vcmask 326912  }
 0x1a1   : > { %v3474_v35 = vadd.f32 -0.4, %v1457_v33  ;;  %v1479_v39 = vmul.f32 %v3473_v30, %v1467_v29  ;;  %v1499_v29 = vld [vmem:[%s4576_s3] sm:$0xf] }
 0x1a2   : > { %v3544_v34 = vpack.c.bf16 %v1481_v31, %v1481_v31 }
 0x1a3   : > { %v1480_v40 = vmul.f32 %v3474_v35, %v1471_v32  ;;  %v4251_v36 = vpack.c.bf16 %v1479_v39, %v1479_v39 }
 0x1a4   : > { %1498 = vst [vmem:[#allocation2 + $0xc] sm:$0xf] %v3544_v34 }
 0x1a5   : > { %v3543_v41 = vpack.c.bf16 %v1480_v40, %v1479_v39  ;;  %v4247_v51 = vpack.c.bf16 %v1480_v40, %v1480_v40 }
 0x1a7   : > { %1497 = vst [vmem:[#allocation2 + $0x4] sm:$0xff] %v3543_v41 }
 0x1ab   : > { %v2057_v55 = vld [vmem:[#allocation2 + $0xc] sm:$0xff] }
 0x1ac   : > { %v3507_v56 = vcombine.low %v2057_v55, %v2057_v55  ;;  %v4259_v37 = vcombine.high %v2057_v55, %v2057_v55  ;;  %v3853_v14 = vld [vmem:[#allocation2 + $0xc] ss:$0 sps:$4 sm:$0xff]  }
 0x1ae   : > { %v1500_v42 = vld [vmem:[#allocation2] sm:$0xff]  ;;  %v1501_v48 = vld [vmem:[#allocation2 + $0x8] sm:$0xff] }
 0x1af   : > { %v3480_v43 = vcombine.high %v1500_v42, %v1500_v42  ;;  %v3479_v47 = vcombine.low %v1500_v42, %v1500_v42  ;;  %v3481_v49 = vcombine.low %v1501_v48, %v1501_v48  ;;  %v3482_v50 = vcombine.high %v1501_v48, %v1501_v48 }
 0x1b1   : > { %1516 = vrot.lane.b32.xlu1 %v3480_v43, %s3929_s17  ;;  %1514 = vrot.lane.b32.xlu0 %v3479_v47, %s3929_s17 }
 0x1b5   : > { %1621 = vrot.lane.b32.xlu1 %v3479_v47, %s3930_s21  ;;  %1518 = vrot.lane.b32.xlu0 %v3481_v49, %s3929_s17 }
 0x1b9   : > { %1625 = vrot.lane.b32.xlu1 %v3481_v49, %s3930_s21  ;;  %2546 = vrot.lane.b32.xlu0 %v4060_v2, %s3924_s29 }
 0x1bd   : > { %1728 = vrot.lane.b32.xlu1 %v3479_v47, %s3931_s22  ;;  %1623 = vrot.lane.b32.xlu0 %v3480_v43, %s3930_s21 }
 0x1c1   : > { %1732 = vrot.lane.b32.xlu1 %v3481_v49, %s3931_s22  ;;  %1520 = vrot.lane.b32.xlu0 %v3482_v50, %s3929_s17  ;;  %s3942_s17 = smov 24  }
 0x1c5   : > { %1838 = vrot.lane.b32.xlu1 %v3479_v47, %s3932_s23  ;;  %1730 = vrot.lane.b32.xlu0 %v3480_v43, %s3931_s22 }
 0x1c9   : > { %1842 = vrot.lane.b32.xlu1 %v3481_v49, %s3932_s23  ;;  %1627 = vrot.lane.b32.xlu0 %v3482_v50, %s3930_s21  ;;  %s3934_s21 = smov 56  }
 0x1cd   : > { %1844 = vrot.lane.b32.xlu1 %v3482_v50, %s3932_s23  ;;  %1840 = vrot.lane.b32.xlu0 %v3480_v43, %s3932_s23 }
 0x1d1   : > { %2070 = vrot.lane.b32.xlu1 %v4247_v51, %s3921_s26  ;;  %1734 = vrot.lane.b32.xlu0 %v3482_v50, %s3931_s22  ;;  %s323_s22 = sand.u32 1, %s3908_s10  }
 0x1d2   : > { %s3435_s23 = sshll.u32 %s323_s22, 3 }
 0x1d5   : > { %2181 = vrot.lane.b32.xlu1 %v3507_v56, %s3933_s24  ;;  %2068 = vrot.lane.b32.xlu0 %v4251_v36, %s3921_s26 }
 0x1d9   : > { %2177 = vrot.lane.b32.xlu1 %v4251_v36, %s3933_s24  ;;  %2072 = vrot.lane.b32.xlu0 %v3507_v56, %s3921_s26 }
 0x1dd   : > { %2291 = vrot.lane.b32.xlu1 %v3507_v56, %s3923_s28  ;;  %2179 = vrot.lane.b32.xlu0 %v4247_v51, %s3933_s24 }
 0x1e1   : > { %2287 = vrot.lane.b32.xlu1 %v4251_v36, %s3923_s28  ;;  %2074 = vrot.lane.b32.xlu0 %v4259_v37, %s3921_s26  ;;  %s3937_s26 = smov 40  }
 0x1e5   : > { %2400 = vrot.lane.b32.xlu1 %v3507_v56, %s3924_s29  ;;  %2289 = vrot.lane.b32.xlu0 %v4247_v51, %s3923_s28  ;;  %v3489_v56 = vld [vmem:[%s4576_s3 + $0x8] sm:$0xf] }
 0x1e9   : > { %2396 = vrot.lane.b32.xlu1 %v4251_v36, %s3924_s29  ;;  %2183 = vrot.lane.b32.xlu0 %v4259_v37, %s3933_s24  ;;  %s4479_s24 = scalar_lea.vmem [#allocation3], %s3435_s23 }
 0x1ea   : > { %s3372_s23 = sshll.u32 %s4479_s24, 4  ;;  %s3373_s23 = int_to_ptr.vmem [resolvable:$true] %s3372_s23 }
 0x1ed   : > { %2398 = vrot.lane.b32.xlu0 %v4247_v51, %s3924_s29 }
 0x1f1   : > { %2293 = vrot.lane.b32.xlu0 %v4259_v37, %s3923_s28  ;;  %s3938_s28 = smov 76  }
 0x223   : > { %v1517_v54 = vpop.permute.xlu1 %1516  ;;  %v1515_v58 = vpop.permute.xlu0 %1514 }
 0x224   : > { %v1523_v62 = vsel %vm1522_vm15, %v1515_v58, %v1517_v54 }
 0x225   : > { %v1532_v9 = vsel %vm1530_vm14, %v1523_v62, 0 }
 0x227   : > { %v1622_v5 = vpop.permute.xlu1 %1621  ;;  %v1519_v6 = vpop.permute.xlu0 %1518 }
 0x228   : > { %v1524_v8 = vsel %vm1522_vm15, %v1517_v54, %v1519_v6 }
 0x229   : > { %3483 = vmatprep.subr.msk.bf16.mxu0 %vm1530_vm14, %v1524_v8 }
 0x22a   : > { %1555 = vmatpush1.bf16.msra.mxu0 %v1532_v9 }
 0x22b   : > { %v1626_v16 = vpop.permute.xlu1 %1625  ;;  %v2547_v17 = vpop.permute.xlu0 %2546 }
 0x22c   : > { %v2549_v18 = vrot.slane %v2547_v17, 4 }
 0x22d   : > { %3484 = vmatmul.mubr.msk.bf16.vlgmr.msra.gmra.mxu0 %vm1526_vm4, %v3478_v13 }
 0x22e   : > { %v2550_v2 = vsel %vm1530_vm14, %v2548_v12, %v2549_v18  ;;  %v2553_v19 = vsel %vm837_vm6, %v2547_v17, %v2549_v18  ;;  %1677 = vmatprep.mubr.bf16.mxu0 %v3919_v1  ;;  %v1968_v18 = vsel %vm1530_vm14, %v3853_v14, 0 }
 0x22f   : > { %v1729_v21 = vpop.permute.xlu1 %1728  ;;  %v1624_v22 = vpop.permute.xlu0 %1623  ;;  %v2552_v23 = vsel %vm837_vm6, %v2545_v46, %v2550_v2  ;;  %v2557_v24 = vadd.f32 %v2553_v19, %v2543_v3  ;;  %v3504_v2 = vld [vmem:[%s4576_s3 + $0x14] sm:$0xf] }
 0x230   : > { %v1630_v25 = vsel %vm1629_vm7, %v1622_v5, %v1624_v22  ;;  %v1631_v26 = vsel %vm1629_vm7, %v1624_v22, %v1626_v16  ;;  %v2556_v27 = vadd.f32 %v2552_v23, %v2542_v20  ;;  %v1962_v5 = vsel %vm1530_vm14, %v4251_v36, 0  ;;  %v3497_v36 = vld [vmem:[%s4576_s3 + $0x10] sm:$0xf] }
 0x231   : > { %v1637_v28 = vsel %vm1530_vm14, %v1630_v25, 0  ;;  %3486 = vmatprep.subr.msk.bf16.mxu0 %vm1530_vm14, %v1631_v26  ;;  %v2559_v33 = vmul.f32 0.25, %v2557_v24 }
 0x232   : > { %1660 = vmatpush1.bf16.msra.mxu0 %v1637_v28  ;;  %v2558_v30 = vmul.f32 0.25, %v2556_v27  ;;  %v3512_v27 = vld [vmem:[%s4576_s3 + $0x18] sm:$0xf] }
 0x233   : > { %v1733_v31 = vpop.permute.xlu1 %1732  ;;  %v1521_v32 = vpop.permute.xlu0 %1520  ;;  %v2569_v49 = vpack.c.bf16 %v2559_v33, %v2559_v33  ;;  %v2564_v50 = vcombine.high %v2559_v33, %v2559_v33 }
 0x234   : > { %v1525_v34 = vsel %vm1522_vm15, %v1519_v6, %v1521_v32  ;;  %v2567_v35 = vpack.c.bf16 %v2558_v30, %v2558_v30  ;;  %v2563_v39 = vcombine.high %v2558_v30, %v2558_v30  ;;  %vm3270_vm15 = vcmask 458112  }
 0x235   : > { %v1538_v40 = vsel %vm1530_vm14, %v1525_v34, 0  ;;  %3487 = vmatmul.mubr.msk.bf16.vlgmr.msra.gmra.mxu0 %vm1526_vm4, %v1499_v29  ;;  %v2570_v46 = vpack.c.bf16 %v2564_v50, %v2564_v50 }
 0x236   : > { %2581 = vrot.lane.b32.xlu1 %v2567_v35, %s3924_s29  ;;  %3662 = vmatpush3.bf16.msra.mxu1 %v1538_v40  ;;  %v2568_v41 = vpack.c.bf16 %v2563_v39, %v2563_v39  ;;  %v3516_v40 = vld [vmem:[%s4576_s3 + $0x1c] sm:$0xf] }
 0x237   : > { %v1839_v42 = vpop.permute.xlu1 %1838  ;;  %v1731_v43 = vpop.permute.xlu0 %1730  ;;  %1784 = vmatprep.mubr.bf16.mxu0 %v3919_v1  ;;  %3667 = vmatprep.subr.bf16.mxu1 %v3918_v0 }
 0x238   : > { %v1737_v47 = vsel %vm1736_vm8, %v1729_v21, %v1731_v43  ;;  %v1738_v48 = vsel %vm1736_vm8, %v1731_v43, %v1733_v31  ;;  %2583 = vrot.lane.b32.xlu0 %v2568_v41, %s3924_s29 }
 0x239   : > { %v1744_v55 = vsel %vm1530_vm14, %v1737_v47, 0  ;;  %3664 = vmatmul.mubr.msk.bf16.vlgmr.msra.gmra.mxu1 %vm1526_vm4, %v3478_v13  ;;  %3490 = vmatprep.subr.msk.bf16.mxu0 %vm1530_vm14, %v1738_v48  ;;  %v3520_v48 = vld [vmem:[%s4576_s3 + $0x20] sm:$0xf] }
 0x23a   : > { %2585 = vrot.lane.b32.xlu1 %v2569_v49, %s3924_s29  ;;  %1767 = vmatpush1.bf16.msra.mxu0 %v1744_v55  ;;  %v2571_v49 = vld [vmem:[%s4579_s6] sm:$0xff] }
 0x23b   : > { %v1843_v44 = vpop.permute.xlu1 %1842  ;;  %v1628_v45 = vpop.permute.xlu0 %1627  ;;  %3669 = vmatprep.mubr.msk.bf16.mxu1 %vm3920_vm0, %v3918_v0 }
 0x23c   : > { %v1632_v38 = vsel %vm1629_vm7, %v1626_v16, %v1628_v45  ;;  %2402 = vrot.lane.b32.xlu0 %v4259_v37, %s3924_s29 }
 0x23d   : > { %v1643_v52 = vsel %vm1530_vm14, %v1632_v38, 0  ;;  %3491 = vmatmul.mubr.msk.bf16.vlgmr.msra.gmra.mxu0 %vm1526_vm4, %v3489_v56 }
 0x23e   : > { %2587 = vrot.lane.b32.xlu1 %v2570_v46, %s3924_s29  ;;  %3668 = vmatpush3.bf16.msra.mxu1 %v1643_v52  ;;  %v2560_v52 = vld [vmem:[%s4578_s5] sm:$0xf]  ;;  %s3935_s29 = smov 112  }
 0x23f   : > { %v1845_v57 = vpop.permute.xlu1 %1844  ;;  %v1841_v54 = vpop.permute.xlu0 %1840  ;;  %1894 = vmatprep.mubr.bf16.mxu0 %v3919_v1  ;;  %3673 = vmatprep.subr.bf16.mxu1 %v3918_v0 }
 0x240   : > { %v1847_v37 = vsel %vm1846_vm9, %v1839_v42, %v1841_v54  ;;  %v1848_v58 = vsel %vm1846_vm9, %v1841_v54, %v1843_v44  ;;  %2506 = vperm.xlu0 %3843, %v2503_v53   ;;  %v1849_v6 = vsel %vm1846_vm9, %v1843_v44, %v1845_v57 }
 0x241   : > { %v1854_v59 = vsel %vm1530_vm14, %v1847_v37, 0  ;;  %3670 = vmatmul.mubr.msk.bf16.vlgmr.msra.gmra.mxu1 %vm1526_vm4, %v1499_v29  ;;  %3494 = vmatprep.subr.msk.bf16.mxu0 %vm1530_vm14, %v1848_v58 }
 0x242   : > { %1877 = vmatpush1.bf16.msra.mxu0 %v1854_v59  ;;  %3675 = vmatprep.mubr.msk.bf16.mxu1 %vm3920_vm0, %v3918_v0 }
 0x243   : > { %v2071_v61 = vpop.permute.xlu1 %2070  ;;  %3501 = vmatprep.subr.msk.bf16.mxu0 %vm1530_vm14, %v4247_v51  ;;  %v1735_v62 = vpop.permute.xlu0 %1734  ;;  %v1860_v51 = vsel %vm1530_vm14, %v1849_v6, 0  ;;  %2574 = vperm.xlu1 %3844, %v2571_v49  }
 0x244   : > { %v1739_v63 = vsel %vm1736_vm8, %v1733_v31, %v1735_v62 }
 0x245   : > { %v1750_v4 = vsel %vm1530_vm14, %v1739_v63, 0  ;;  %3495 = vmatmul.mubr.msk.bf16.vlgmr.msra.gmra.mxu0 %vm1526_vm4, %v3493_v60 }
 0x246   : > { %3674 = vmatpush3.bf16.msra.mxu1 %v1750_v4  ;;  %1985 = vmatpush1.bf16.msra.mxu0 %v1962_v5 }
 0x247   : > { %v2182_v7 = vpop.permute.xlu1 %2181  ;;  %v2069_v8 = vpop.permute.xlu0 %2068  ;;  %3679 = vmatprep.subr.bf16.mxu1 %v3918_v0  ;;  %2002 = vmatprep.mubr.bf16.mxu0 %v3919_v1 }
 0x248   : > { %v2076_v9 = vsel %vm367_vm1, %v2069_v8, %v2071_v61  ;;  %v4452_v8 = vld [vmem:[%s4581_s8 + $0x8] sm:$0xff] }
 0x249   : > { %3676 = vmatmul.mubr.msk.bf16.vlgmr.msra.gmra.mxu1 %vm1526_vm4, %v3489_v56  ;;  %v2083_v13 = vsel %vm1530_vm14, %v2076_v9, 0 }
 0x24a   : > { %3680 = vmatpush3.bf16.msra.mxu1 %v1860_v51  ;;  %3681 = vmatprep.mubr.msk.bf16.mxu1 %vm3920_vm0, %v3918_v0 }
 0x24b   : > { %v2178_v10 = vpop.permute.xlu1 %2177  ;;  %v2073_v11 = vpop.permute.xlu0 %2072  ;;  %3685 = vmatprep.subr.bf16.mxu1 %v3918_v0 }
 0x24c   : > { %v2077_v12 = vsel %vm367_vm1, %v2071_v61, %v2073_v11 }
 0x24d   : > { %3502 = vmatmul.mubr.msk.bf16.vlgmr.msra.gmra.mxu0 %vm1526_vm4, %v3497_v36  ;;  %3509 = vmatprep.subr.msk.bf16.mxu0 %vm1530_vm14, %v2077_v12 }
 0x24e   : > { %2106 = vmatpush1.bf16.msra.mxu0 %v2083_v13  ;;  %2123 = vmatprep.mubr.bf16.mxu0 %v3919_v1 }
 0x24f   : > { %v2292_v15 = vpop.permute.xlu1 %2291  ;;  %v2180_v16 = vpop.permute.xlu0 %2179 }
 0x250   : > { %v2187_v17 = vsel %vm2185_vm10, %v2180_v16, %v2182_v7  ;;  %v2186_v3 = vsel %vm2185_vm10, %v2178_v10, %v2180_v16 }
 0x251   : > { %3682 = vmatmul.mubr.msk.bf16.vlgmr.msra.gmra.mxu1 %vm1526_vm4, %v3493_v60  ;;  %3513 = vmatprep.subr.msk.bf16.mxu0 %vm1530_vm14, %v2187_v17  ;;  %v2193_v20 = vsel %vm1530_vm14, %v2186_v3, 0 }
 0x252   : > { %3686 = vmatpush3.bf16.msra.mxu1 %v1968_v18  ;;  %3687 = vmatprep.mubr.msk.bf16.mxu1 %vm3920_vm0, %v3918_v0 }
 0x253   : > { %v2075_v19 = vpop.permute.xlu0 %2074  ;;  %3691 = vmatprep.subr.bf16.mxu1 %v3918_v0  ;;  %v2288_v21 = vpop.permute.xlu1 %2287 }
 0x254   : > { %v2078_v22 = vsel %vm367_vm1, %v2073_v11, %v2075_v19 }
 0x255   : > { %3510 = vmatmul.mubr.msk.bf16.vlgmr.msra.gmra.mxu0 %vm1526_vm4, %v3504_v2  ;;  %v2089_v25 = vsel %vm1530_vm14, %v2078_v22, 0 }
 0x256   : > { %2216 = vmatpush1.bf16.msra.mxu0 %v2193_v20  ;;  %2233 = vmatprep.mubr.bf16.mxu0 %v3919_v1 }
 0x257   : > { %v2290_v23 = vpop.permute.xlu0 %2289  ;;  %v2401_v28 = vpop.permute.xlu1 %2400 }
 0x258   : > { %v2296_v24 = vsel %vm711_vm5, %v2290_v23, %v2292_v15  ;;  %v2295_v26 = vsel %vm711_vm5, %v2288_v21, %v2290_v23 }
 0x259   : > { %3688 = vmatmul.mubr.msk.bf16.vlgmr.msra.gmra.mxu1 %vm1526_vm4, %v3497_v36  ;;  %3517 = vmatprep.subr.msk.bf16.mxu0 %vm1530_vm14, %v2296_v24  ;;  %v2302_v30 = vsel %vm1530_vm14, %v2295_v26, 0  ;;  %v4460_v36 = vld [vmem:[%s4581_s8] sm:$0xff] }
 0x25a   : > { %3692 = vmatpush3.bf16.msra.mxu1 %v2089_v25  ;;  %3693 = vmatprep.mubr.msk.bf16.mxu1 %vm3920_vm0, %v3918_v0 }
 0x25b   : > { %v2184_v29 = vpop.permute.xlu0 %2183  ;;  %3697 = vmatprep.subr.bf16.mxu1 %v3918_v0  ;;  %v2397_v34 = vpop.permute.xlu1 %2396 }
 0x25c   : > { %v2188_v31 = vsel %vm2185_vm10, %v2182_v7, %v2184_v29 }
 0x25d   : > { %3514 = vmatmul.mubr.msk.bf16.vlgmr.msra.gmra.mxu0 %vm1526_vm4, %v3512_v27  ;;  %v2199_v35 = vsel %vm1530_vm14, %v2188_v31, 0 }
 0x25e   : > { %2325 = vmatpush1.bf16.msra.mxu0 %v2302_v30  ;;  %2342 = vmatprep.mubr.bf16.mxu0 %v3919_v1 }
 0x25f   : > { %v2399_v32 = vpop.permute.xlu0 %2398 }
 0x260   : > { %v2405_v33 = vsel %vm837_vm6, %v2399_v32, %v2401_v28  ;;  %v2404_v39 = vsel %vm837_vm6, %v2397_v34, %v2399_v32 }
 0x261   : > { %3694 = vmatmul.mubr.msk.bf16.vlgmr.msra.gmra.mxu1 %vm1526_vm4, %v3504_v2  ;;  %3521 = vmatprep.subr.msk.bf16.mxu0 %vm1530_vm14, %v2405_v33  ;;  %v2411_v42 = vsel %vm1530_vm14, %v2404_v39, 0 }
 0x262   : > { %3698 = vmatpush3.bf16.msra.mxu1 %v2199_v35  ;;  %3699 = vmatprep.mubr.msk.bf16.mxu1 %vm3920_vm0, %v3918_v0 }
 0x263   : > { %v2294_v41 = vpop.permute.xlu0 %2293  ;;  %3703 = vmatprep.subr.bf16.mxu1 %v3918_v0 }
 0x264   : > { %v2297_v43 = vsel %vm711_vm5, %v2292_v15, %v2294_v41  ;;  %vm2704_vm5 = vcmask 130048  }
 0x265   : > { %3518 = vmatmul.mubr.msk.bf16.vlgmr.msra.gmra.mxu0 %vm1526_vm4, %v3516_v40  ;;  %v2308_v47 = vsel %vm1530_vm14, %v2297_v43, 0 }
 0x266   : > { %2434 = vmatpush1.bf16.msra.mxu0 %v2411_v42  ;;  %2451 = vmatprep.mubr.bf16.mxu0 %v3919_v1 }
 0x269   : > { %3700 = vmatmul.mubr.msk.bf16.vlgmr.msra.gmra.mxu1 %vm1526_vm4, %v3512_v27 }
 0x26a   : > { %3704 = vmatpush3.bf16.msra.mxu1 %v2308_v47  ;;  %3705 = vmatprep.mubr.msk.bf16.mxu1 %vm3920_vm0, %v3918_v0 }
 0x26b   : > { %3709 = vmatprep.subr.bf16.mxu1 %v3918_v0 }
 0x26d   : > { %3522 = vmatmul.mubr.msk.bf16.vlgmr.msra.gmra.mxu0 %vm1526_vm4, %v3520_v48 }
 0x26e   : > { %2636 = vmatprep.mubr.bf16.mxu0 %v3919_v1 }
 0x271   : > { %3706 = vmatmul.mubr.msk.bf16.vlgmr.msra.gmra.mxu1 %vm1526_vm4, %v3516_v40 }
 0x272   : > { %3711 = vmatprep.mubr.msk.bf16.mxu1 %vm3920_vm0, %v3918_v0 }
 0x2a8   : > { %v2582_v50 = vpop.permute.xlu1 %2581 }
 0x2aa   : > { %v2584_v55 = vpop.permute.xlu0 %2583 }
 0x2ab   : > { %v2589_v56 = vsel %vm837_vm6, %v2582_v50, %v2584_v55 }
 0x2ac   : > { %v2586_v44 = vpop.permute.xlu1 %2585  ;;  %v2596_v38 = vsel %vm375_vm2, %v2589_v56, 0 }
 0x2ad   : > { %v2590_v45 = vsel %vm837_vm6, %v2584_v55, %v2586_v44 }
 0x2ae   : > { %3524 = vmatprep.subr.msk.bf16.mxu0 %vm375_vm2, %v2590_v45  ;;  %v2403_v1 = vpop.permute.xlu0 %2402 }
 0x2af   : > { %v2406_v46 = vsel %vm837_vm6, %v2401_v28, %v2403_v1  ;;  %2619 = vmatpush1.bf16.msra.mxu0 %v2596_v38 }
 0x2b0   : > { %v2417_v53 = vsel %vm1530_vm14, %v2406_v46, 0  ;;  %v2588_v57 = vpop.permute.xlu1 %2587  ;;  %3721 = vmatprep.subr.mxu0 %v3918_v0  ;;  %vm3188_vm14 = vcmask 392512  }
 0x2b1   : > { %v2591_v54 = vsel %vm837_vm6, %v2586_v44, %v2588_v57  ;;  %3710 = vmatpush3.bf16.msra.mxu1 %v2417_v53  ;;  %vm2700_vm6 = vcmask 1048064  }
 0x2b2   : > { %3525 = vmatmul.mubr.msk.bf16.vlgmr.msra.gmra.mxu0 %vm371_vm3, %v2560_v52  ;;  %3715 = vmatprep.subr.bf16.mxu1 %v3918_v0  ;;  %v2602_v37 = vsel %vm375_vm2, %v2591_v54, 0  ;;  %2701 = vst.msk [vmem:[%s4479_s24] sm:$0xff] %vm2700_vm6, %v3918_v0 }
 0x2b3   : > { %3725 = vmatprep.mubr.msk.f32.mxu0 %vm3920_vm0, %v3918_v0  ;;  %3722 = vmatpush3.msra.mxu0 %v4452_v8 }
 0x2b4   : > { %3712 = vmatmul.mubr.msk.bf16.vlgmr.msra.gmra.mxu1 %vm1526_vm4, %v3520_v48  ;;  %3723 = vmatprep.subr.mxu0 %v3918_v0 }
 0x2b5   : > { %3716 = vmatpush3.bf16.msra.mxu1 %v2602_v37  ;;  %3717 = vmatprep.mubr.msk.bf16.mxu1 %vm3920_vm0, %v3918_v0 }
 0x2b6   : > { %3728 = vmatprep.subr.mxu1 %v3918_v0  ;;  %3724 = vmatpush3.msra.mxu0 %v4460_v36 }
 0x2b7   : > { %3735 = vmatprep.subr.mxu0 %v3918_v0 }
 0x2bc   : > { %3718 = vmatmul.mubr.msk.bf16.vlgmr.msra.gmra.mxu1 %vm371_vm3, %v2560_v52 }
 0x2bd   : > { %3732 = vmatprep.mubr.msk.f32.mxu1 %vm3920_vm0, %v3918_v0  ;;  %3729 = vmatpush3.msra.mxu1 %v4452_v8 }
 0x2be   : > { %3730 = vmatprep.subr.mxu1 %v3918_v0 }
 0x2bf   : > { %3731 = vmatpush3.msra.mxu1 %v4460_v36 }
 0x2c0   : > { %3742 = vmatprep.subr.mxu1 %v3918_v0 }
 0x2ed   : > { %v1574_v58 = vpop.f32.mrf.mxu0 }
 0x2ef   : > { %v1576_v59 = vpop.f32.mrf.mxu0 }
 0x2f1   : > { %v1578_v60 = vpop.f32.mrf.mxu0 }
 0x2f3   : > { %v1579_v61 = vpop.f32.mrf.mxu0 }
 0x2f5   : > { %v1679_v62 = vpop.f32.mrf.mxu0 }
 0x2f6   : > { %v1680_v63 = vadd.f32 %v1679_v62, %v1574_v58 }
 0x2f7   : > { %v1681_v4 = vpop.f32.mrf.mxu0 }
 0x2f8   : > { %v1682_v5 = vadd.f32 %v1681_v4, %v1576_v59 }
 0x2f9   : > { %v1683_v6 = vpop.f32.mrf.mxu0  ;;  %v1615_v7 = vpop.f32.mrf.mxu1 }
 0x2fb   : > { %v1684_v51 = vpop.f32.mrf.mxu0  ;;  %v3665_v9 = vpop.f32.mrf.mxu1 }
 0x2fd   : > { %v1786_v10 = vpop.f32.mrf.mxu0  ;;  %v1618_v11 = vpop.f32.mrf.mxu1 }
 0x2fe   : > { %v1833_v12 = vadd.f32 %v1786_v10, %v1680_v63 }
 0x2ff   : > { %v1788_v13 = vpop.f32.mrf.mxu0  ;;  %v3666_v14 = vpop.f32.mrf.mxu1 }
 0x300   : > { %v1834_v15 = vadd.f32 %v1788_v13, %v1682_v5 }
 0x301   : > { %v1790_v16 = vpop.f32.mrf.mxu0  ;;  %v1720_v17 = vpop.f32.mrf.mxu1 }
 0x302   : > { %v1721_v18 = vadd.f32 %v1720_v17, %v1615_v7 }
 0x303   : > { %v1791_v3 = vpop.f32.mrf.mxu0  ;;  %v3671_v2 = vpop.f32.mrf.mxu1 }
 0x305   : > { %v1896_v19 = vpop.f32.mrf.mxu0  ;;  %v1723_v20 = vpop.f32.mrf.mxu1 }
 0x306   : > { %v1943_v21 = vadd.f32 %v1896_v19, %v1833_v12 }
 0x307   : > { %v1898_v22 = vpop.f32.mrf.mxu0  ;;  %v3672_v23 = vpop.f32.mrf.mxu1 }
 0x308   : > { %v1944_v24 = vadd.f32 %v1898_v22, %v1834_v15 }
 0x309   : > { %v1900_v25 = vpop.f32.mrf.mxu0  ;;  %v1827_v26 = vpop.f32.mrf.mxu1 }
 0x30a   : > { %v1835_v27 = vadd.f32 %v1827_v26, %v1721_v18  ;;  %v2575_v26 = vpop.permute.xlu1 %2574 }
 0x30b   : > { %v1901_v28 = vpop.f32.mrf.mxu0  ;;  %v3677_v29 = vpop.f32.mrf.mxu1 }
 0x30d   : > { %v2004_v30 = vpop.f32.mrf.mxu0  ;;  %v1830_v31 = vpop.f32.mrf.mxu1 }
 0x30e   : > { %v2051_v32 = vadd.f32 %v2004_v30, %v1943_v21 }
 0x30f   : > { %v2006_v33 = vpop.f32.mrf.mxu0  ;;  %v3678_v34 = vpop.f32.mrf.mxu1 }
 0x310   : > { %v2052_v35 = vadd.f32 %v2006_v33, %v1944_v24 }
 0x311   : > { %v2008_v39 = vpop.f32.mrf.mxu0  ;;  %v1937_v40 = vpop.f32.mrf.mxu1 }
 0x312   : > { %v1945_v41 = vadd.f32 %v1937_v40, %v1835_v27  ;;  %v2507_v27 = vpop.permute.xlu0 %2506 }
 0x313   : > { %v2009_v42 = vpop.f32.mrf.mxu0  ;;  %v3683_v43 = vpop.f32.mrf.mxu1 }
 0x315   : > { %v2125_v47 = vpop.f32.mrf.mxu0  ;;  %v1940_v48 = vpop.f32.mrf.mxu1 }
 0x316   : > { %v2172_v49 = vadd.f32 %v2125_v47, %v2051_v32 }
 0x317   : > { %v2127_v50 = vpop.f32.mrf.mxu0  ;;  %v3684_v55 = vpop.f32.mrf.mxu1 }
 0x318   : > { %v2173_v56 = vadd.f32 %v2127_v50, %v2052_v35 }
 0x319   : > { %v2129_v44 = vpop.f32.mrf.mxu0  ;;  %v2045_v45 = vpop.f32.mrf.mxu1 }
 0x31a   : > { %v2053_v38 = vadd.f32 %v2045_v45, %v1945_v41 }
 0x31b   : > { %v2130_v1 = vpop.f32.mrf.mxu0  ;;  %v3689_v46 = vpop.f32.mrf.mxu1 }
 0x31d   : > { %v2235_v52 = vpop.f32.mrf.mxu0  ;;  %v2048_v53 = vpop.f32.mrf.mxu1 }
 0x31e   : > { %v2282_v57 = vadd.f32 %v2235_v52, %v2172_v49 }
 0x31f   : > { %v2237_v54 = vpop.f32.mrf.mxu0  ;;  %v3690_v37 = vpop.f32.mrf.mxu1 }
 0x320   : > { %v2283_v58 = vadd.f32 %v2237_v54, %v2173_v56 }
 0x321   : > { %v2239_v59 = vpop.f32.mrf.mxu0  ;;  %v2166_v60 = vpop.f32.mrf.mxu1 }
 0x322   : > { %v2174_v61 = vadd.f32 %v2166_v60, %v2053_v38 }
 0x323   : > { %v2240_v62 = vpop.f32.mrf.mxu0  ;;  %v3695_v63 = vpop.f32.mrf.mxu1 }
 0x325   : > { %v2344_v4 = vpop.f32.mrf.mxu0  ;;  %v2169_v5 = vpop.f32.mrf.mxu1 }
 0x326   : > { %v2391_v6 = vadd.f32 %v2344_v4, %v2282_v57 }
 0x327   : > { %v2346_v7 = vpop.f32.mrf.mxu0  ;;  %v3696_v51 = vpop.f32.mrf.mxu1 }
 0x328   : > { %v2392_v9 = vadd.f32 %v2346_v7, %v2283_v58 }
 0x329   : > { %v2348_v10 = vpop.f32.mrf.mxu0  ;;  %v2276_v11 = vpop.f32.mrf.mxu1 }
 0x32a   : > { %v2284_v12 = vadd.f32 %v2276_v11, %v2174_v61 }
 0x32b   : > { %v2349_v13 = vpop.f32.mrf.mxu0  ;;  %v3701_v14 = vpop.f32.mrf.mxu1 }
 0x32d   : > { %v2453_v15 = vpop.f32.mrf.mxu0  ;;  %v2279_v16 = vpop.f32.mrf.mxu1 }
 0x32e   : > { %v2500_v17 = vadd.f32 %v2453_v15, %v2391_v6 }
 0x32f   : > { %v2455_v18 = vpop.f32.mrf.mxu0  ;;  %v3702_v3 = vpop.f32.mrf.mxu1 }
 0x330   : > { %v2501_v2 = vadd.f32 %v2455_v18, %v2392_v9  ;;  %v2509_v29 = vadd.f32 %v2507_v27, %v2500_v17 }
 0x331   : > { %v2385_v19 = vpop.f32.mrf.mxu1  ;;  %v2457_v20 = vpop.f32.mrf.mxu0 }
 0x332   : > { %v2393_v21 = vadd.f32 %v2385_v19, %v2284_v12  ;;  %v2510_v33 = vadd.f32 %v2507_v27, %v2501_v2 }
 0x333   : > { %v3707_v22 = vpop.f32.mrf.mxu1  ;;  %v2458_v23 = vpop.f32.mrf.mxu0 }
 0x335   : > { %v2388_v24 = vpop.f32.mrf.mxu1 }
 0x337   : > { %v3708_v25 = vpop.f32.mrf.mxu1 }
 0x372   : > { %v2638_v28 = vpop.f32.mrf.mxu0 }
 0x373   : > { %v2639_v30 = vadd.f32 %v2638_v28, %v2575_v26 }
 0x374   : > { %v2494_v31 = vpop.f32.mrf.mxu1  ;;  %v2640_v32 = vpop.f32.mrf.mxu0 }
 0x375   : > { %v2685_v34 = vadd.f32 %v2639_v30, %v2509_v29  ;;  %v2641_v35 = vadd.f32 %v2640_v32, %v2575_v26  ;;  %v2502_v49 = vadd.f32 %v2494_v31, %v2393_v21 }
 0x376   : > { %v3713_v39 = vpop.f32.mrf.mxu1  ;;  %v2642_v40 = vpop.f32.mrf.mxu0 }
 0x377   : > { %vm2688_vm1 = vcmp.ge.f32.partialorder %v2685_v34, 0.0  ;;  %v2691_v41 = vmul.f32 0.1, %v2685_v34  ;;  %v2686_v42 = vadd.f32 %v2641_v35, %v2510_v33  ;;  %v2511_v38 = vadd.f32 %v2507_v27, %v2502_v49 }
 0x378   : > { %v2497_v43 = vpop.f32.mrf.mxu1  ;;  %v2643_v47 = vpop.f32.mrf.mxu0 }
 0x379   : > { %v2694_v48 = vsel %vm2688_vm1, %v2685_v34, %v2691_v41  ;;  %vm2689_vm2 = vcmp.ge.f32.partialorder %v2686_v42, 0.0  ;;  %v2692_v50 = vmul.f32 0.1, %v2686_v42 }
 0x37a   : > { %v3527_v55 = vadd.f32 -0.4, %v2694_v48  ;;  %v3714_v56 = vpop.f32.mrf.mxu1 }
 0x37b   : > { %v2695_v44 = vsel %vm2689_vm2, %v2686_v42, %v2692_v50 }
 0x37c   : > { %v2679_v45 = vpop.f32.mrf.mxu1  ;;  %2863 = vrot.lane.b32.xlu1 %v3527_v55, %s3934_s21  ;;  %2781 = vrot.lane.b32.xlu0 %v3527_v55, %s3926_s16  ;;  %v3528_v46 = vadd.f32 -0.4, %v2695_v44  ;;  %s3936_s16 = smov 20  }
 0x37d   : > { %v2680_v1 = vadd.f32 %v2679_v45, %v2575_v26  ;;  %3726 = vmatmul.mubr.msk.f32.vlgmr.msra.gmra.mxu0 %vm2704_vm5, %v3527_v55 }
 0x37e   : > { %v3719_v52 = vpop.f32.mrf.mxu1  ;;  %3736 = vmatpush3.msra.mxu0 %v4452_v8  ;;  %3739 = vmatprep.mubr.msk.f32.mxu0 %vm3920_vm0, %v3918_v0 }
 0x37f   : > { %v2687_v53 = vadd.f32 %v2680_v1, %v2511_v38  ;;  %3737 = vmatprep.subr.mxu0 %v3918_v0 }
 0x380   : > { %3028 = vrot.lane.b32.xlu1 %v3528_v46, %s3935_s29  ;;  %2945 = vrot.lane.b32.xlu0 %v3527_v55, %s3936_s16  ;;  %v2682_v57 = vpop.f32.mrf.mxu1  ;;  %s3943_s29 = smov 32   ;;  %s3944_s16 = smov 48  }
 0x381   : > { %v2693_v54 = vmul.f32 0.1, %v2687_v53  ;;  %vm2690_vm11 = vcmp.ge.f32.partialorder %v2687_v53, 0.0  ;;  %3738 = vmatpush3.msra.mxu0 %v4460_v36 }
 0x382   : > { %v3720_v37 = vpop.f32.mrf.mxu1  ;;  %3749 = vmatprep.subr.mxu0 %v3918_v0 }
 0x383   : > { %v2696_v58 = vsel %vm2690_vm11, %v2687_v53, %v2693_v54 }
 0x384   : > { %3192 = vrot.lane.b32.xlu1 %v3528_v46, %s3937_s26  ;;  %3110 = vrot.lane.b32.xlu0 %v3528_v46, %s3938_s28  ;;  %v3529_v59 = vadd.f32 -0.4, %v2696_v58 }
 0x388   : > { %3277 = vrot.lane.b32.xlu1 %v3529_v59, %s3939_s25  ;;  %3275 = vrot.lane.b32.xlu0 %v3528_v46, %s3939_s25 }
 0x3ee   : > { %v2864_v60 = vpop.permute.xlu1 %2863  ;;  %v2782_v61 = vpop.permute.xlu0 %2781 }
 0x3ef   : > { %3733 = vmatmul.mubr.msk.f32.vlgmr.msra.gmra.mxu1 %vm2704_vm5, %v2782_v61  ;;  %3740 = vmatmul.mubr.msk.f32.vlgmr.msra.gmra.mxu0 %vm2704_vm5, %v2864_v60 }
 0x3f0   : > { %3743 = vmatpush3.msra.mxu1 %v4452_v8  ;;  %3750 = vmatpush3.msra.mxu0 %v4452_v8 }
 0x3f1   : > { %3744 = vmatprep.subr.mxu1 %v3918_v0  ;;  %3751 = vmatprep.subr.mxu0 %v3918_v0 }
 0x3f2   : > { %v3029_v62 = vpop.permute.xlu1 %3028  ;;  %3745 = vmatpush3.msra.mxu1 %v4460_v36  ;;  %3746 = vmatprep.mubr.msk.f32.mxu1 %vm3920_vm0, %v3918_v0  ;;  %v2946_v63 = vpop.permute.xlu0 %2945 }
 0x3f3   : > { %3752 = vmatpush3.msra.mxu0 %v4460_v36  ;;  %3753 = vmatprep.mubr.msk.f32.mxu0 %vm3920_vm0, %v3918_v0 }
 0x3f4   : > { %3747 = vmatmul.mubr.msk.f32.vlgmr.msra.gmra.mxu1 %vm2704_vm5, %v2946_v63  ;;  %3754 = vmatmul.mubr.msk.f32.vlgmr.msra.gmra.mxu0 %vm2704_vm5, %v3029_v62 }
 0x3f5   : > { %3756 = vmatprep.subr.mxu1 %v3918_v0  ;;  %3763 = vmatprep.subr.mxu0 %v3918_v0 }
 0x3f6   : > { %3757 = vmatpush3.msra.mxu1 %v4452_v8  ;;  %3764 = vmatpush3.msra.mxu0 %v4452_v8  ;;  %v3193_v4 = vpop.permute.xlu1 %3192  ;;  %v3111_v5 = vpop.permute.xlu0 %3110 }
 0x3f7   : > { %3758 = vmatprep.subr.mxu1 %v3918_v0  ;;  %3765 = vmatprep.subr.mxu0 %v3918_v0 }
 0x3f8   : > { %3759 = vmatpush3.msra.mxu1 %v4460_v36  ;;  %3760 = vmatprep.mubr.msk.f32.mxu1 %vm3920_vm0, %v3918_v0 }
 0x3f9   : > { %3766 = vmatpush3.msra.mxu0 %v4460_v36  ;;  %3767 = vmatprep.mubr.msk.f32.mxu0 %vm3920_vm0, %v3918_v0 }
 0x3fa   : > { %3761 = vmatmul.mubr.msk.f32.vlgmr.msra.gmra.mxu1 %vm2704_vm5, %v3111_v5  ;;  %3768 = vmatmul.mubr.msk.f32.vlgmr.msra.gmra.mxu0 %vm2704_vm5, %v3193_v4  ;;  %v3278_v6 = vpop.permute.xlu1 %3277  ;;  %v3276_v7 = vpop.permute.xlu0 %3275 }
 0x3fb   : > { %3770 = vmatprep.subr.mxu1 %v3918_v0  ;;  %3774 = vmatprep.mubr.msk.f32.mxu1 %vm3920_vm0, %v3918_v0  ;;  %v3279_v51 = vsel %vm371_vm3, %v3276_v7, %v3278_v6  ;;  %vm2859_vm0 = vcmask 130112   ;;  %vm2941_vm3 = vcmask 195712  }
 0x3fc   : > { %3771 = vmatpush3.msra.mxu1 %v4452_v8 }
 0x3fd   : > { %3772 = vmatprep.subr.mxu1 %v3918_v0 }
 0x3fe   : > { %3773 = vmatpush3.msra.mxu1 %v4460_v36 }
 0x3ff   : > { %3775 = vmatmul.mubr.msk.f32.vlgmr.msra.gmra.mxu1 %vm2704_vm5, %v3279_v51 }
 0x43d   : > { %v2774_v9 = vpop.f32.mrf.mxu0 }
 0x43e   : > { %2778 = vst.msk [vmem:[%s4479_s24] sm:$0xff] %vm1526_vm4, %v2774_v9  ;;  %vm3356_vm4 = vcmask 523712  }
 0x43f   : > { %v3727_v10 = vpop.f32.mrf.mxu0 }
 0x4af   : > { %v2851_v11 = vpop.f32.mrf.mxu1  ;;  %v2933_v12 = vpop.f32.mrf.mxu0 }
 0x4b0   : > { %2856 = vrot.lane.b32.xlu0 %v2851_v11, %s3940_s27  ;;  %2938 = vrot.lane.b32.xlu1 %v2933_v12, %s3941_s14  ;;  %s3359_s27 = scalar_lea.sflag [#allocation4], %s323_s22  ;;  %s3856_s14 = scalar_lea.vmem %s3373_s23, 128 }
 0x4b1   : > { %v3734_v13 = vpop.f32.mrf.mxu1  ;;  %v3741_v8 = vpop.f32.mrf.mxu0  ;;  %p3857_p11 = scmp.ne.s32.totalorder %s3373_s23, %s3856_s14 }
 0x4b3   : > { %p3858_p12 = pnand %p3857_p11, %p4034_p5 }
 0x4b4   : > { %v3015_v14 = vpop.f32.mrf.mxu1  ;;  %v3098_v15 = vpop.f32.mrf.mxu0 }
 0x4b5   : > { %3020 = vrot.lane.b32.xlu0 %v3015_v14, %s3942_s17  ;;  %3103 = vrot.lane.b32.xlu1 %v3098_v15, %s3943_s29  ;;  %p3859_p13 = pneg %p3858_p12  ;;  %s3945_s17 = smov [#allocation3]  }
 0x4b6   : > { %v3748_v0 = vpop.f32.mrf.mxu1  ;;  %v3755_v36 = vpop.f32.mrf.mxu0 }
 0x4ba   : > { %v3180_v16 = vpop.f32.mrf.mxu1  ;;  %v3262_v17 = vpop.f32.mrf.mxu0 }
 0x4bb   : > { %3185 = vrot.lane.b32.xlu0 %v3180_v16, %s3937_s26  ;;  %3267 = vrot.lane.b32.xlu1 %v3262_v17, %s3944_s16 }
 0x4bc   : > { %v3762_v18 = vpop.f32.mrf.mxu1  ;;  %v3769_v3 = vpop.f32.mrf.mxu0 }
 0x4bf   : > { %v3348_v2 = vpop.f32.mrf.mxu1 }
 0x4c0   : > { %3353 = vrot.lane.b32.xlu0 %v3348_v2, %s3934_s21  ;;  %s3539_s21 = sshll.u32 %s4017_s13, 7  ;;  %s3860_s13 = sshll.u32 %s3945_s17, 4  ;;  %s3861_s13 = int_to_ptr.vmem [resolvable:$false] %s3860_s13 }
 0x4c1   : > { %v3776_v19 = vpop.f32.mrf.mxu1  ;;  %s4535_s25 = scalar_lea.hbm %s4582_s9, %s3539_s21  ;;  %s3862_s29 = scalar_lea.vmem %s3861_s13, 256 }
 0x4c2   : > { %p3863_p0 = scmp.lt.s32.totalorder %s3373_s23, %s3861_s13  ;;  %p3864_p1 = scmp.lt.s32.totalorder %s3862_s29, %s3856_s14 }
 0x4c4   : > { %p3865_p2 = por %p3864_p1, %p3863_p0 }
 0x4c6   : > { %p3866_p3 = pnand %p3865_p2, %p3859_p13 }
 0x522   : > { %v2857_v20 = vpop.permute.xlu0 %2856  ;;  %v2939_v21 = vpop.permute.xlu1 %2938 }
 0x523   : > { %2860 = vst.msk [vmem:[%s4479_s24] sm:$0xff] %vm2859_vm0, %v2857_v20 }
 0x524   : > { %2942 = vst.msk [vmem:[%s4479_s24] sm:$0xff] %vm2941_vm3, %v2939_v21 }
 0x527   : > { %v3021_v22 = vpop.permute.xlu0 %3020  ;;  %v3104_v23 = vpop.permute.xlu1 %3103 }
 0x528   : > { %3024 = vst.msk [vmem:[%s4479_s24] sm:$0xff] %vm3023_vm12, %v3021_v22 }
 0x529   : > { %3107 = vst.msk [vmem:[%s4479_s24] sm:$0xff] %vm3106_vm13, %v3104_v23 }
 0x52d   : > { %v3186_v24 = vpop.permute.xlu0 %3185  ;;  %v3268_v25 = vpop.permute.xlu1 %3267 }
 0x52e   : > { %3189 = vst.msk [vmem:[%s4479_s24] sm:$0xff] %vm3188_vm14, %v3186_v24 }
 0x52f   : > { %3271 = vst.msk [vmem:[%s4479_s24] sm:$0xff] %vm3270_vm15, %v3268_v25 }
 0x532   : > { %v3354_v26 = vpop.permute.xlu0 %3353 }
 0x533   : > { %3357 = vst.msk [vmem:[%s4479_s24] sm:$0xff] %vm3356_vm4, %v3354_v26 }
 0x534   : > { %3869 = shalt.err (!%p3866_p3)
}
 0x535   : > { %s3870_s24 = scalar_lea.hbm %s4535_s25, 128  ;;  %s3874_s21 = scalar_lea.hbm %s4582_s9, 256 }
 0x536   : > { %p3871_p4 = scmp.ne.s32.totalorder %s4535_s25, %s3870_s24  ;;  %p3875_p9 = scmp.lt.s32.totalorder %s4535_s25, %s4582_s9 }
 0x537   : > { %p3876_p10 = scmp.lt.s32.totalorder %s3874_s21, %s3870_s24 }
 0x538   : > { %p3872_p7 = pnand %p3871_p4, %p4034_p5 }
 0x539   : > { %p3877_p11 = por %p3876_p10, %p3875_p9 }
 0x53a   : > { %p3873_p8 = pneg %p3872_p7 }
 0x53c   : > { %p3878_p12 = pnand %p3877_p11, %p3873_p8 }
 0x53e   : > { %3881 = shalt.err (!%p3878_p12)
}
 0x53f   : > { %3777 = dma.vmem_to_hbm [thread:$0]  (%p4034_p5), %s3373_s23, 128, %s4535_s25, %s3359_s27  }
 0x540 PF: > { %p3783_p13 = scmp.ge.s32.totalorder %s3916_s12, 2  ;;  %s3384_s14 = sand.u32 1, %s3904_s30  }
 0x541   : > { %s3385_s17 = scalar_lea.sflag [#allocation4], %s3384_s14 }
 0x542   : > { %p3780_p0 = pnand %p3783_p13, %p4038_p6 }
 0x544   : > { %p3781_p1 = pneg %p3780_p0 }
 0x546   : > { %3899 = dma.done.wait (%p3781_p1), %s3385_s17, 128  }
 0x547   : > { %3901 = vsyncadd (%p3781_p1), %s3385_s17, 4294967168  ;;  %p19_p2 = scmp.ge.s32.totalorder %s4021_s15, 4   ;;  %s4585_s30 = smov %s3908_s10 }
 0x548   : > { %s4586_s10 = smov %s3912_s11  ;;  %s4587_s11 = smov %s4032_s18 }
 0x549   : > { %s4588_s12 = smov %s4021_s15  ;;  %21 = sbr.rel (!%p19_p2) target bundleno = 3 (0x3), region = 107 }
 0x54e   :  { %3390 = vsyncpa [#allocation4], 1 }
 0x54f   :  { %3392 = vsyncpa [#allocation4 + $0x1], 1 }

</bundles_post_ra>
